<compile_context>
chip_gen: v7x
topology: tpu7x:2x2x1
jax: 0.10.0
libtpu: 0.0.40
codegen_flags: <defaults>
</compile_context>

<pallas_src>
import functools

import jax
import jax.numpy as jnp
from jax.experimental import pallas as pl
from jax.experimental.pallas import tpu as pltpu

D_MODEL = 256
D_HID = 128
N_FRAMES = 4
LN_EPS = 1e-5
N_LOGITS = 5      # 2 gender + 3 age
HEAD_PAD = 8      # fused classification-head width (zero-padded)

# Row indices of the packed (N_ROWS, 256) f32 bias / LayerNorm / dequant-scale slab.
# 128-wide vectors occupy lanes 0:128 of their row.
ROW_DS_B = 0      # downsampling_v effective bias (Linear(4,1) bias folded in)
ROW_AV = 1        # 7 rows per MTCMA block: ln_v g, ln_v b, b_vo, fc1 b, mlp_ln g, mlp_ln b, fc2 b
ROW_VA = 8
ROW_GEN_B = 15
ROW_AGE_B = 16
ROW_HEAD_B = 17
ROW_S_DS = 18     # int8 dequant scale rows (per output channel)
ROW_S_AV = 19     # wvo scale, fc1 scale (128), fc2 scale
ROW_S_VA = 22
ROW_S_GEN = 25
ROW_S_AGE = 26
N_ROWS = 27


# --------------------------------------------------------------------------- in-kernel math
def _gelu_tanh(x):
    # nn.GELU(approximate='tanh'); tanh runs on the EUP slot instead of a long VPU erf chain.
    return 0.5 * x * (1.0 + jnp.tanh(0.7978845608028654 * (x + 0.044715 * x * x * x)))


def _layer_norm(x, g, b):
    mu = jnp.mean(x, axis=-1, keepdims=True)
    var = jnp.mean(jnp.square(x - mu), axis=-1, keepdims=True)
    return (x - mu) * jax.lax.rsqrt(var + LN_EPS) * g + b


def _forward_packed(a, v, w1, vec, ds_w, av_wvo, av_fc1, av_fc2,
                    va_wvo, va_fc1, va_fc2, gen_w, age_w, head_w):
    """Shared forward math.  Arguments may be Pallas Refs (inside the kernel) or plain
    jnp arrays (pure-JAX reference); both support the same [...] / slicing syntax."""
    vec_all = vec[...]                                   # (N_ROWS, 256) f32
    row = lambda r: vec_all[r:r + 1, :]                  # (1, 256)
    row128 = lambda r: vec_all[r:r + 1, :D_HID]          # (1, 128)

    def qdot(x_f32, wq, srow, out128=False):
        # int8 weight -> bf16 at the MXU boundary (DMA compression only; MXU stays bf16 so
        # this is portable to v5e/v6e/v7x), f32 accumulation, per-output-channel dequant
        # scale applied as one VPU multiply on the f32 accumulator.
        w = wq[...].astype(jnp.float32).astype(jnp.bfloat16)
        acc = jnp.dot(x_f32.astype(jnp.bfloat16), w, preferred_element_type=jnp.float32)
        return acc * (row128(srow) if out128 else row(srow))

    a_f = a[...].astype(jnp.float32)                     # (B, 256) "audio token" (bf16 in)
    v_f = v[...].astype(jnp.float32)                     # (B, 4, 128) visual frames (bf16 in)

    # downsampling_v: Linear(4,1) over the frame axis (its bias is folded into ROW_DS_B),
    # then Linear(128,256).
    v_mid = jnp.sum(v_f * w1[...], axis=1)               # (B, 128)
    v_ds = qdot(v_mid, ds_w, ROW_S_DS) + row(ROW_DS_B)   # (B, 256) "visual token"

    def mtcma(kv, wvo, fc1, fc2, r0, s0):
        # MTCMAModelV2 in eval mode with q_len = kv_len = 1: the per-head softmax over one
        # key is exactly 1, so attention == out_proj(v_proj(norm_v(values))); the q/k path
        # cancels and wv@wo is pre-folded into `wvo` by pack_params.
        vn = _layer_norm(kv, row(r0), row(r0 + 1))
        x = qdot(vn, wvo, s0) + row(r0 + 2)
        # mlp: Linear(256,128) -> GELU -> Dropout(id) -> LayerNorm(128) -> Linear(128,256)
        #      -> GELU -> Dropout(id)
        h = _gelu_tanh(qdot(x, fc1, s0 + 1, out128=True) + row128(r0 + 3))
        h = _layer_norm(h, row128(r0 + 4), row128(r0 + 5))
        h = _gelu_tanh(qdot(h, fc2, s0 + 2) + row(r0 + 6))
        return x + h

    av = a_f + mtcma(v_ds, av_wvo, av_fc1, av_fc2, ROW_AV, ROW_S_AV)   # queries only enter via residual
    va = v_ds + mtcma(a_f, va_wvo, va_fc1, va_fc2, ROW_VA, ROW_S_VA)

    g_feat = jnp.maximum(qdot(av, gen_w, ROW_S_GEN) + row(ROW_GEN_B), 0.0)   # Linear+ReLU (+Dropout=id)
    a_feat = jnp.maximum(qdot(va, age_w, ROW_S_AGE) + row(ROW_AGE_B), 0.0)
    fused = g_feat + a_feat

    # Fused classification head: gender (2) + age (3) logits in one (256,8) bf16 matmul.
    head = jnp.dot(fused.astype(jnp.bfloat16), head_w[...], preferred_element_type=jnp.float32)
    return head + row(ROW_HEAD_B)[:, :HEAD_PAD]          # (B, 8)


# --------------------------------------------------------------------------- Pallas kernel
def _kernel(a_ref, v_ref, w1_ref, vec_ref, ds_ref,
            av_wvo_ref, av_fc1_ref, av_fc2_ref,
            va_wvo_ref, va_fc1_ref, va_fc2_ref,
            gen_ref, age_ref, head_ref, out_ref):
    out_ref[...] = _forward_packed(a_ref, v_ref, w1_ref, vec_ref, ds_ref,
                                   av_wvo_ref, av_fc1_ref, av_fc2_ref,
                                   va_wvo_ref, va_fc1_ref, va_fc2_ref,
                                   gen_ref, age_ref, head_ref)


def _default_tile_b():
    # 128-row activation tiles match v5e's 4x(128x128) MXU; 256 fills v6e/v7x's 256x256 MXU.
    try:
        kind = jax.devices()[0].device_kind.lower()
    except Exception:
        return 256
    return 128 if ("v5 lite" in kind or "v5e" in kind or "v5litepod" in kind) else 256


@functools.partial(jax.jit, static_argnames=("tile_b",))
def _forward(a, v, pk, tile_b):
    B = a.shape[0]
    tb = B if B <= tile_b else tile_b                 # single full-dim block for small batches
    b_pad = ((B + tb - 1) // tb) * tb
    if b_pad != B:
        a = jnp.pad(a, ((0, b_pad - B), (0, 0)))
        v = jnp.pad(v, ((0, b_pad - B), (0, 0), (0, 0)))
    # bf16 activations halve activation HBM traffic; math inside the kernel is f32 on the VPU.
    a = a.astype(jnp.bfloat16)
    v = v.astype(jnp.bfloat16)
    n_tiles = b_pad // tb

    flops = 2 * b_pad * (D_HID * D_MODEL                       # downsampling
                         + 2 * (D_MODEL * D_MODEL + D_MODEL * D_HID + D_HID * D_MODEL)  # 2x MTCMA
                         + 2 * D_MODEL * D_MODEL                # gender/age branches
                         + D_MODEL * HEAD_PAD)                  # fused head
    weight_bytes = (3 * D_MODEL * D_MODEL + D_HID * D_MODEL    # int8: wvo x2, gen, age... (see below)
                    + 2 * D_MODEL * D_MODEL                     # gen_w, age_w int8
                    + 4 * D_MODEL * D_HID                       # fc1/fc2 x2 int8
                    + 2 * D_MODEL * HEAD_PAD                    # head bf16
                    + 4 * N_ROWS * D_MODEL + 4 * N_FRAMES)      # vec slab + w1 (f32)
    act_bytes = b_pad * (2 * (D_MODEL + N_FRAMES * D_HID) + 4 * HEAD_PAD)

    logits = pl.pallas_call(
        _kernel,
        out_shape=jax.ShapeDtypeStruct((b_pad, HEAD_PAD), jnp.float32),
        grid_spec=pltpu.PrefetchScalarGridSpec(
            num_scalar_prefetch=0,
            grid=(n_tiles,),
            in_specs=[
                pl.BlockSpec((tb, D_MODEL), lambda i: (i, 0)),            # a   (streams)
                pl.BlockSpec((tb, N_FRAMES, D_HID), lambda i: (i, 0, 0)),  # v   (streams)
                # every weight operand: constant index_map => VMEM-resident, DMA'd once
                pl.BlockSpec((1, N_FRAMES, 1), lambda i: (0, 0, 0)),       # w1 (f32, tiny)
                pl.BlockSpec((N_ROWS, D_MODEL), lambda i: (0, 0)),         # packed vec slab
                pl.BlockSpec((D_HID, D_MODEL), lambda i: (0, 0)),          # ds_w   (int8)
                pl.BlockSpec((D_MODEL, D_MODEL), lambda i: (0, 0)),        # av_wvo (int8)
                pl.BlockSpec((D_MODEL, D_HID), lambda i: (0, 0)),          # av_fc1 (int8)
                pl.BlockSpec((D_HID, D_MODEL), lambda i: (0, 0)),          # av_fc2 (int8)
                pl.BlockSpec((D_MODEL, D_MODEL), lambda i: (0, 0)),        # va_wvo (int8)
                pl.BlockSpec((D_MODEL, D_HID), lambda i: (0, 0)),          # va_fc1 (int8)
                pl.BlockSpec((D_HID, D_MODEL), lambda i: (0, 0)),          # va_fc2 (int8)
                pl.BlockSpec((D_MODEL, D_MODEL), lambda i: (0, 0)),        # gen_w  (int8)
                pl.BlockSpec((D_MODEL, D_MODEL), lambda i: (0, 0)),        # age_w  (int8)
                pl.BlockSpec((D_MODEL, HEAD_PAD), lambda i: (0, 0)),       # head_w (bf16)
            ],
            out_specs=pl.BlockSpec((tb, HEAD_PAD), lambda i: (i, 0)),
        ),
        compiler_params=pltpu.CompilerParams(dimension_semantics=("parallel",)),
        cost_estimate=pl.CostEstimate(flops=int(flops),
                                      transcendentals=int(b_pad * 800),
                                      bytes_accessed=int(weight_bytes + act_bytes)),
    )(a, v, pk["w1"], pk["vec"], pk["ds_w"],
      pk["av_wvo"], pk["av_fc1"], pk["av_fc2"],
      pk["va_wvo"], pk["va_fc1"], pk["va_fc2"],
      pk["gen_w"], pk["age_w"], pk["head_w"])

    return logits[:B, :2], logits[:B, 2:N_LOGITS]


def mask_agender_av_model_v3(a, v, pk, tile_b=None):
    if tile_b is None:
        tile_b = _default_tile_b()
    return _forward(a, v, pk, tile_b=tile_b)


# --------------------------------------------------------------------------- parameters
def make_params(key):
    """Raw f32 parameters matching the PyTorch module semantics.  Linear weights are stored
    (in_features, out_features), i.e. y = x @ W + b (== torch's x @ W_t.T + b)."""
    keys = iter(jax.random.split(key, 64))

    def dense(n_in, n_out, scale=0.02):
        return {"w": scale * jax.random.normal(next(keys), (n_in, n_out), jnp.float32),
                "b": 0.01 * jax.random.normal(next(keys), (1, n_out), jnp.float32)}

    def ln(n):  # torch LayerNorm default init
        return {"g": jnp.ones((1, n), jnp.float32), "b": jnp.zeros((1, n), jnp.float32)}

    def mtcma():
        # norm_q / norm_k / wq / wk exist in the torch module but are mathematically dead
        # for q_len = kv_len = 1 in eval mode, so they are not created (and never DMA'd).
        return {"ln_v": ln(D_MODEL),
                "wv": dense(D_MODEL, D_MODEL), "wo": dense(D_MODEL, D_MODEL),
                "mlp_fc1": dense(D_MODEL, D_HID), "mlp_ln": ln(D_HID),
                "mlp_fc2": dense(D_HID, D_MODEL)}

    return {
        "ds_v1": dense(N_FRAMES, 1),          # downsampling_v: Linear(4,1)
        "ds_v2": dense(D_HID, D_MODEL),       # downsampling_v: Linear(128,256)
        "mtcma_av": mtcma(),
        "mtcma_va": mtcma(),
        "gender_branch": dense(D_MODEL, D_MODEL),
        "age_branch": dense(D_MODEL, D_MODEL),
        # TODO(synk): MaskAGenderClassificationHead / MultiHeadAttention sources were not
        # provided; the head is modeled as two linear heads (gender -> 2 logits,
        # age -> output_size=3 logits) applied to the fused (x_gender + x_age) features.
        "cl_gender": dense(D_MODEL, 2),
        "cl_age": dense(D_MODEL, 3),
    }


def pack_params(p):
    """One-time (wrapper-side) folding / packing / quantization into the kernel operand set:
      - wv@wo folded into a single W_vo (+ folded bias) per MTCMA block
      - Linear(4,1) bias folded into the downsampling effective bias
      - gender/age classification heads fused into one (256, 8) matrix
      - the 8 large weight matrices quantized to per-output-channel symmetric int8
        (dequant scale rows packed into the vec slab; head stays bf16)
      - all bias / LayerNorm / scale vectors packed into ONE (27, 256) f32 slab."""
    def fold_vo(m):
        w_vo = m["wv"]["w"] @ m["wo"]["w"]
        b_vo = m["wv"]["b"] @ m["wo"]["w"] + m["wo"]["b"]
        return w_vo, b_vo

    av_wvo_f, av_bvo = fold_vo(p["mtcma_av"])
    va_wvo_f, va_bvo = fold_vo(p["mtcma_va"])

    # (raw + b1) @ W2 + b2  ==  raw @ W2 + (b2 + b1 * colsum(W2))
    ds_b_eff = p["ds_v2"]["b"] + p["ds_v1"]["b"][0, 0] * jnp.sum(p["ds_v2"]["w"], axis=0, keepdims=True)

    head_w = jnp.zeros((D_MODEL, HEAD_PAD), jnp.float32)
    head_w = head_w.at[:, 0:2].set(p["cl_gender"]["w"]).at[:, 2:N_LOGITS].set(p["cl_age"]["w"])
    head_b = jnp.zeros((1, HEAD_PAD), jnp.float32)
    head_b = head_b.at[:, 0:2].set(p["cl_gender"]["b"]).at[:, 2:N_LOGITS].set(p["cl_age"]["b"])

    def q8(w):  # symmetric per-output-channel int8
        amax = jnp.maximum(jnp.max(jnp.abs(w), axis=0, keepdims=True), 1e-8)
        scale = (amax / 127.0).astype(jnp.float32)
        wq = jnp.clip(jnp.round(w / scale), -127.0, 127.0).astype(jnp.int8)
        return wq, scale

    ds_wq, ds_s = q8(p["ds_v2"]["w"])
    av_wvo_q, av_wvo_s = q8(av_wvo_f)
    av_fc1_q, av_fc1_s = q8(p["mtcma_av"]["mlp_fc1"]["w"])
    av_fc2_q, av_fc2_s = q8(p["mtcma_av"]["mlp_fc2"]["w"])
    va_wvo_q, va_wvo_s = q8(va_wvo_f)
    va_fc1_q, va_fc1_s = q8(p["mtcma_va"]["mlp_fc1"]["w"])
    va_fc2_q, va_fc2_s = q8(p["mtcma_va"]["mlp_fc2"]["w"])
    gen_q, gen_s = q8(p["gender_branch"]["w"])
    age_q, age_s = q8(p["age_branch"]["w"])

    def pad256(x):
        return jnp.pad(x, ((0, 0), (0, D_MODEL - x.shape[1])))

    def block_rows(m, b_vo):
        return [m["ln_v"]["g"], m["ln_v"]["b"], b_vo,
                pad256(m["mlp_fc1"]["b"]), pad256(m["mlp_ln"]["g"]),
                pad256(m["mlp_ln"]["b"]), m["mlp_fc2"]["b"]]

    vec = jnp.concatenate(
        [ds_b_eff]
        + block_rows(p["mtcma_av"], av_bvo)
        + block_rows(p["mtcma_va"], va_bvo)
        + [p["gender_branch"]["b"], p["age_branch"]["b"], pad256(head_b),
           ds_s,
           av_wvo_s, pad256(av_fc1_s), av_fc2_s,
           va_wvo_s, pad256(va_fc1_s), va_fc2_s,
           gen_s, age_s],
        axis=0).astype(jnp.float32)                      # (27, 256) f32
    assert vec.shape == (N_ROWS, D_MODEL)

    return {
        "w1": p["ds_v1"]["w"].reshape(1, N_FRAMES, 1),   # tiny f32, broadcasts over (B,4,128)
        "vec": vec,
        "ds_w": ds_wq,
        "av_wvo": av_wvo_q, "av_fc1": av_fc1_q, "av_fc2": av_fc2_q,
        "va_wvo": va_wvo_q, "va_fc1": va_fc1_q, "va_fc2": va_fc2_q,
        "gen_w": gen_q, "age_w": age_q,
        "head_w": head_w.astype(jnp.bfloat16),
    }


def _packed_reference(a, v, pk):
    """Pure-JAX forward on the same packed/quantized operands (identical math to the kernel)."""
    return _forward_packed(a.astype(jnp.bfloat16), v.astype(jnp.bfloat16),
                           pk["w1"], pk["vec"], pk["ds_w"],
                           pk["av_wvo"], pk["av_fc1"], pk["av_fc2"],
                           pk["va_wvo"], pk["va_fc1"], pk["va_fc2"],
                           pk["gen_w"], pk["age_w"], pk["head_w"])


# --------------------------------------------------------------------------- f32 reference
def _reference_f32(a, v, p):
    """Original-module math in f32 (unfolded weights, exact erf GELU) — semantic check that
    covers the int8 / bf16 / folding / tanh-GELU approximations used by the kernel."""
    def linear(x, d):
        return x @ d["w"] + d["b"]

    def lnorm(x, d):
        mu = jnp.mean(x, axis=-1, keepdims=True)
        var = jnp.mean(jnp.square(x - mu), axis=-1, keepdims=True)
        return (x - mu) * jax.lax.rsqrt(var + LN_EPS) * d["g"] + d["b"]

    def gelu(x):  # torch nn.GELU() default (exact erf)
        return 0.5 * x * (1.0 + jax.lax.erf(x * 0.7071067811865476))

    def mtcma(kv, m):
        x = linear(linear(lnorm(kv, m["ln_v"]), m["wv"]), m["wo"])
        h = gelu(linear(x, m["mlp_fc1"]))
        h = lnorm(h, m["mlp_ln"])
        h = gelu(linear(h, m["mlp_fc2"]))
        return x + h

    v_mid = jnp.sum(v * p["ds_v1"]["w"].reshape(1, N_FRAMES, 1), axis=1) + p["ds_v1"]["b"][0, 0]
    v_ds = linear(v_mid, p["ds_v2"])
    av = a + mtcma(v_ds, p["mtcma_av"])
    va = v_ds + mtcma(a, p["mtcma_va"])
    g_feat = jnp.maximum(linear(av, p["gender_branch"]), 0.0)
    a_feat = jnp.maximum(linear(va, p["age_branch"]), 0.0)
    fused = g_feat + a_feat
    return linear(fused, p["cl_gender"]), linear(fused, p["cl_age"])


# --------------------------------------------------------------------------- driver
if __name__ == "__main__":
    root = jax.random.PRNGKey(0)
    k_a, k_v, k_p, k_a2, k_v2 = jax.random.split(root, 5)
    params = make_params(k_p)
    packed = pack_params(params)        # one-time folding / packing / int8 quant, outside the kernel

    # --- primary: B=2, single full-dim block (weights DMA'd exactly once) ---
    B = 2
    a = jax.random.normal(k_a, (B, D_MODEL), dtype=jnp.float32)          # audio features (B, 256)
    v = jax.random.normal(k_v, (B, N_FRAMES, D_HID), dtype=jnp.float32)  # visual features (B, 4, 128)

    gender_logits, age_logits = mask_agender_av_model_v3(a, v, packed)
    jax.block_until_ready((gender_logits, age_logits))
    assert gender_logits.shape == (B, 2) and age_logits.shape == (B, 3)

    # Tight check: kernel vs. identical-math pure-JAX forward on the packed operands.
    ref = _packed_reference(a, v, packed)
    assert jnp.allclose(gender_logits, ref[:, :2], atol=3e-3, rtol=3e-3)
    assert jnp.allclose(age_logits, ref[:, 2:N_LOGITS], atol=3e-3, rtol=3e-3)

    # Loose semantic check: full-precision, unfolded, exact-GELU original-module math.
    f32_g, f32_a = _reference_f32(a, v, params)
    assert jnp.allclose(gender_logits, f32_g, atol=5e-2, rtol=5e-2)
    assert jnp.allclose(age_logits, f32_a, atol=5e-2, rtol=5e-2)

    # --- secondary: exercise the batched grid path (padding + weight-resident tiles) at a
    #     still-small shape: B=20 with 8-row tiles -> pad to 24, grid=(3,). ---
    B2 = 20
    a2 = jax.random.normal(k_a2, (B2, D_MODEL), dtype=jnp.float32)
    v2 = jax.random.normal(k_v2, (B2, N_FRAMES, D_HID), dtype=jnp.float32)
    g2, ag2 = mask_agender_av_model_v3(a2, v2, packed, tile_b=8)
    jax.block_until_ready((g2, ag2))
    assert g2.shape == (B2, 2) and ag2.shape == (B2, 3)
    ref2 = _packed_reference(a2, v2, packed)
    assert jnp.allclose(g2, ref2[:, :2], atol=3e-3, rtol=3e-3)
    assert jnp.allclose(ag2, ref2[:, 2:N_LOGITS], atol=3e-3, rtol=3e-3)

    print("KERNEL_OK")
</pallas_src>

<mosaic_0001>
module attributes {stable_mosaic.version = 11 : i64} {
  func.func @_kernel(%arg0: i32, %arg1: memref<2x256xbf16, #tpu.memory_space<vmem>>, %arg2: memref<2x4x128xbf16, #tpu.memory_space<vmem>>, %arg3: memref<1x4x1xf32, #tpu.memory_space<vmem>>, %arg4: memref<27x256xf32, #tpu.memory_space<vmem>>, %arg5: memref<128x256xi8, #tpu.memory_space<vmem>>, %arg6: memref<256x256xi8, #tpu.memory_space<vmem>>, %arg7: memref<256x128xi8, #tpu.memory_space<vmem>>, %arg8: memref<128x256xi8, #tpu.memory_space<vmem>>, %arg9: memref<256x256xi8, #tpu.memory_space<vmem>>, %arg10: memref<256x128xi8, #tpu.memory_space<vmem>>, %arg11: memref<128x256xi8, #tpu.memory_space<vmem>>, %arg12: memref<256x256xi8, #tpu.memory_space<vmem>>, %arg13: memref<256x256xi8, #tpu.memory_space<vmem>>, %arg14: memref<256x8xbf16, #tpu.memory_space<vmem>>, %arg15: memref<2x8xf32, #tpu.memory_space<vmem>>) attributes {dimension_semantics = [#tpu.dimension_semantics<parallel>], iteration_bounds = array<i64: 1>, scalar_prefetch = 0 : i64, scratch_operands = 0 : i64, tpu.core_type = #tpu.core_type<tc>, window_params = [{transform_indices = @transform_0, window_bounds = array<i64: 2, 256>}, {transform_indices = @transform_1, window_bounds = array<i64: 2, 4, 128>}, {pipeline_mode = #tpu.pipeline_mode<synchronous>, transform_indices = @transform_2, window_bounds = array<i64: 1, 4, 1>}, {pipeline_mode = #tpu.pipeline_mode<synchronous>, transform_indices = @transform_3, window_bounds = array<i64: 27, 256>}, {pipeline_mode = #tpu.pipeline_mode<synchronous>, transform_indices = @transform_4, window_bounds = array<i64: 128, 256>}, {pipeline_mode = #tpu.pipeline_mode<synchronous>, transform_indices = @transform_5, window_bounds = array<i64: 256, 256>}, {pipeline_mode = #tpu.pipeline_mode<synchronous>, transform_indices = @transform_6, window_bounds = array<i64: 256, 128>}, {pipeline_mode = #tpu.pipeline_mode<synchronous>, transform_indices = @transform_7, window_bounds = array<i64: 128, 256>}, {pipeline_mode = #tpu.pipeline_mode<synchronous>, transform_indices = @transform_8, window_bounds = array<i64: 256, 256>}, {pipeline_mode = #tpu.pipeline_mode<synchronous>, transform_indices = @transform_9, window_bounds = array<i64: 256, 128>}, {pipeline_mode = #tpu.pipeline_mode<synchronous>, transform_indices = @transform_10, window_bounds = array<i64: 128, 256>}, {pipeline_mode = #tpu.pipeline_mode<synchronous>, transform_indices = @transform_11, window_bounds = array<i64: 256, 256>}, {pipeline_mode = #tpu.pipeline_mode<synchronous>, transform_indices = @transform_12, window_bounds = array<i64: 256, 256>}, {pipeline_mode = #tpu.pipeline_mode<synchronous>, transform_indices = @transform_13, window_bounds = array<i64: 256, 8>}, {transform_indices = @transform_14, window_bounds = array<i64: 2, 8>}]} {
    %c0 = arith.constant 0 : index
    %c0_0 = arith.constant 0 : index
    %0 = vector.load %arg4[%c0, %c0_0] : memref<27x256xf32, #tpu.memory_space<vmem>>, vector<27x256xf32>
    %c0_1 = arith.constant 0 : index
    %c0_2 = arith.constant 0 : index
    %1 = vector.load %arg1[%c0_1, %c0_2] : memref<2x256xbf16, #tpu.memory_space<vmem>>, vector<2x256xbf16>
    %2 = arith.extf %1 : vector<2x256xbf16> to vector<2x256xf32>
    %c0_3 = arith.constant 0 : index
    %c0_4 = arith.constant 0 : index
    %c0_5 = arith.constant 0 : index
    %3 = vector.load %arg2[%c0_3, %c0_4, %c0_5] : memref<2x4x128xbf16, #tpu.memory_space<vmem>>, vector<2x4x128xbf16>
    %4 = arith.extf %3 : vector<2x4x128xbf16> to vector<2x4x128xf32>
    %c0_6 = arith.constant 0 : index
    %c0_7 = arith.constant 0 : index
    %c0_8 = arith.constant 0 : index
    %5 = vector.load %arg3[%c0_6, %c0_7, %c0_8] : memref<1x4x1xf32, #tpu.memory_space<vmem>>, vector<1x4x1xf32>
    %6 = vector.broadcast %5 : vector<1x4x1xf32> to vector<2x4x128xf32>
    %7 = arith.mulf %4, %6 : vector<2x4x128xf32>
    %cst = arith.constant dense<0.000000e+00> : vector<2x128xf32>
    %8 = vector.multi_reduction <add>, %7, %cst [1] : vector<2x4x128xf32> to vector<2x128xf32>
    %c0_9 = arith.constant 0 : index
    %c0_10 = arith.constant 0 : index
    %9 = vector.load %arg5[%c0_9, %c0_10] : memref<128x256xi8, #tpu.memory_space<vmem>>, vector<128x256xi8>
    %10 = arith.sitofp %9 : vector<128x256xi8> to vector<128x256xf32>
    %11 = arith.truncf %10 : vector<128x256xf32> to vector<128x256xbf16>
    %12 = arith.truncf %8 : vector<2x128xf32> to vector<2x128xbf16>
    %cst_11 = arith.constant dense<0.000000e+00> : vector<2x256xf32>
    %13 = tpu.matmul %12, %11, %cst_11 {dimension_numbers = #tpu.dot_dimension_numbers<[1], [0], [0], [1], [0, 0, 1, 1], [], []>} : vector<2x128xbf16>, vector<128x256xbf16>, vector<2x256xf32> -> vector<2x256xf32>
    %14 = vector.extract_strided_slice %0 {offsets = [18, 0], sizes = [1, 256], strides = [1, 1]} : vector<27x256xf32> to vector<1x256xf32>
    %15 = vector.broadcast %14 : vector<1x256xf32> to vector<2x256xf32>
    %16 = arith.mulf %13, %15 : vector<2x256xf32>
    %17 = vector.extract_strided_slice %0 {offsets = [0, 0], sizes = [1, 256], strides = [1, 1]} : vector<27x256xf32> to vector<1x256xf32>
    %18 = vector.broadcast %17 : vector<1x256xf32> to vector<2x256xf32>
    %19 = arith.addf %16, %18 : vector<2x256xf32>
    %20 = vector.extract_strided_slice %0 {offsets = [1, 0], sizes = [1, 256], strides = [1, 1]} : vector<27x256xf32> to vector<1x256xf32>
    %21 = vector.extract_strided_slice %0 {offsets = [2, 0], sizes = [1, 256], strides = [1, 1]} : vector<27x256xf32> to vector<1x256xf32>
    %cst_12 = arith.constant dense<0.000000e+00> : vector<2xf32>
    %22 = vector.multi_reduction <add>, %19, %cst_12 [1] : vector<2x256xf32> to vector<2xf32>
    %23 = vector.shape_cast %22 : vector<2xf32> to vector<2x1xf32>
    %cst_13 = arith.constant 2.560000e+02 : f32
    %24 = vector.broadcast %cst_13 : f32 to vector<2x1xf32>
    %25 = arith.divf %23, %24 : vector<2x1xf32>
    %26 = vector.broadcast %25 : vector<2x1xf32> to vector<2x256xf32>
    %27 = arith.subf %19, %26 : vector<2x256xf32>
    %28 = arith.mulf %27, %27 : vector<2x256xf32>
    %cst_14 = arith.constant dense<0.000000e+00> : vector<2xf32>
    %29 = vector.multi_reduction <add>, %28, %cst_14 [1] : vector<2x256xf32> to vector<2xf32>
    %30 = vector.shape_cast %29 : vector<2xf32> to vector<2x1xf32>
    %cst_15 = arith.constant 2.560000e+02 : f32
    %31 = vector.broadcast %cst_15 : f32 to vector<2x1xf32>
    %32 = arith.divf %30, %31 : vector<2x1xf32>
    %33 = vector.broadcast %25 : vector<2x1xf32> to vector<2x256xf32>
    %34 = arith.subf %19, %33 : vector<2x256xf32>
    %cst_16 = arith.constant 9.99999974E-6 : f32
    %35 = vector.broadcast %cst_16 : f32 to vector<2x1xf32>
    %36 = arith.addf %32, %35 : vector<2x1xf32>
    %37 = math.rsqrt %36 : vector<2x1xf32>
    %38 = vector.broadcast %37 : vector<2x1xf32> to vector<2x256xf32>
    %39 = arith.mulf %34, %38 : vector<2x256xf32>
    %40 = vector.broadcast %20 : vector<1x256xf32> to vector<2x256xf32>
    %41 = arith.mulf %39, %40 : vector<2x256xf32>
    %42 = vector.broadcast %21 : vector<1x256xf32> to vector<2x256xf32>
    %43 = arith.addf %41, %42 : vector<2x256xf32>
    %c0_17 = arith.constant 0 : index
    %c0_18 = arith.constant 0 : index
    %44 = vector.load %arg6[%c0_17, %c0_18] : memref<256x256xi8, #tpu.memory_space<vmem>>, vector<256x256xi8>
    %45 = arith.sitofp %44 : vector<256x256xi8> to vector<256x256xf32>
    %46 = arith.truncf %45 : vector<256x256xf32> to vector<256x256xbf16>
    %47 = arith.truncf %43 : vector<2x256xf32> to vector<2x256xbf16>
    %cst_19 = arith.constant dense<0.000000e+00> : vector<2x256xf32>
    %48 = tpu.matmul %47, %46, %cst_19 {dimension_numbers = #tpu.dot_dimension_numbers<[1], [0], [0], [1], [0, 0, 1, 1], [], []>} : vector<2x256xbf16>, vector<256x256xbf16>, vector<2x256xf32> -> vector<2x256xf32>
    %49 = vector.extract_strided_slice %0 {offsets = [19, 0], sizes = [1, 256], strides = [1, 1]} : vector<27x256xf32> to vector<1x256xf32>
    %50 = vector.broadcast %49 : vector<1x256xf32> to vector<2x256xf32>
    %51 = arith.mulf %48, %50 : vector<2x256xf32>
    %52 = vector.extract_strided_slice %0 {offsets = [3, 0], sizes = [1, 256], strides = [1, 1]} : vector<27x256xf32> to vector<1x256xf32>
    %53 = vector.broadcast %52 : vector<1x256xf32> to vector<2x256xf32>
    %54 = arith.addf %51, %53 : vector<2x256xf32>
    %c0_20 = arith.constant 0 : index
    %c0_21 = arith.constant 0 : index
    %55 = vector.load %arg7[%c0_20, %c0_21] : memref<256x128xi8, #tpu.memory_space<vmem>>, vector<256x128xi8>
    %56 = arith.sitofp %55 : vector<256x128xi8> to vector<256x128xf32>
    %57 = arith.truncf %56 : vector<256x128xf32> to vector<256x128xbf16>
    %58 = arith.truncf %54 : vector<2x256xf32> to vector<2x256xbf16>
    %cst_22 = arith.constant dense<0.000000e+00> : vector<2x128xf32>
    %59 = tpu.matmul %58, %57, %cst_22 {dimension_numbers = #tpu.dot_dimension_numbers<[1], [0], [0], [1], [0, 0, 1, 1], [], []>} : vector<2x256xbf16>, vector<256x128xbf16>, vector<2x128xf32> -> vector<2x128xf32>
    %60 = vector.extract_strided_slice %0 {offsets = [20, 0], sizes = [1, 128], strides = [1, 1]} : vector<27x256xf32> to vector<1x128xf32>
    %61 = vector.broadcast %60 : vector<1x128xf32> to vector<2x128xf32>
    %62 = arith.mulf %59, %61 : vector<2x128xf32>
    %63 = vector.extract_strided_slice %0 {offsets = [4, 0], sizes = [1, 128], strides = [1, 1]} : vector<27x256xf32> to vector<1x128xf32>
    %64 = vector.broadcast %63 : vector<1x128xf32> to vector<2x128xf32>
    %65 = arith.addf %62, %64 : vector<2x128xf32>
    %cst_23 = arith.constant 5.000000e-01 : f32
    %66 = vector.broadcast %cst_23 : f32 to vector<2x128xf32>
    %67 = arith.mulf %66, %65 : vector<2x128xf32>
    %cst_24 = arith.constant 4.471500e-02 : f32
    %68 = vector.broadcast %cst_24 : f32 to vector<2x128xf32>
    %69 = arith.mulf %68, %65 : vector<2x128xf32>
    %70 = arith.mulf %69, %65 : vector<2x128xf32>
    %71 = arith.mulf %70, %65 : vector<2x128xf32>
    %72 = arith.addf %65, %71 : vector<2x128xf32>
    %cst_25 = arith.constant 0.797884583 : f32
    %73 = vector.broadcast %cst_25 : f32 to vector<2x128xf32>
    %74 = arith.mulf %73, %72 : vector<2x128xf32>
    %75 = math.tanh %74 : vector<2x128xf32>
    %cst_26 = arith.constant 1.000000e+00 : f32
    %76 = vector.broadcast %cst_26 : f32 to vector<2x128xf32>
    %77 = arith.addf %76, %75 : vector<2x128xf32>
    %78 = arith.mulf %67, %77 : vector<2x128xf32>
    %79 = vector.extract_strided_slice %0 {offsets = [5, 0], sizes = [1, 128], strides = [1, 1]} : vector<27x256xf32> to vector<1x128xf32>
    %80 = vector.extract_strided_slice %0 {offsets = [6, 0], sizes = [1, 128], strides = [1, 1]} : vector<27x256xf32> to vector<1x128xf32>
    %cst_27 = arith.constant dense<0.000000e+00> : vector<2xf32>
    %81 = vector.multi_reduction <add>, %78, %cst_27 [1] : vector<2x128xf32> to vector<2xf32>
    %82 = vector.shape_cast %81 : vector<2xf32> to vector<2x1xf32>
    %cst_28 = arith.constant 1.280000e+02 : f32
    %83 = vector.broadcast %cst_28 : f32 to vector<2x1xf32>
    %84 = arith.divf %82, %83 : vector<2x1xf32>
    %85 = vector.broadcast %84 : vector<2x1xf32> to vector<2x128xf32>
    %86 = arith.subf %78, %85 : vector<2x128xf32>
    %87 = arith.mulf %86, %86 : vector<2x128xf32>
    %cst_29 = arith.constant dense<0.000000e+00> : vector<2xf32>
    %88 = vector.multi_reduction <add>, %87, %cst_29 [1] : vector<2x128xf32> to vector<2xf32>
    %89 = vector.shape_cast %88 : vector<2xf32> to vector<2x1xf32>
    %cst_30 = arith.constant 1.280000e+02 : f32
    %90 = vector.broadcast %cst_30 : f32 to vector<2x1xf32>
    %91 = arith.divf %89, %90 : vector<2x1xf32>
    %92 = vector.broadcast %84 : vector<2x1xf32> to vector<2x128xf32>
    %93 = arith.subf %78, %92 : vector<2x128xf32>
    %cst_31 = arith.constant 9.99999974E-6 : f32
    %94 = vector.broadcast %cst_31 : f32 to vector<2x1xf32>
    %95 = arith.addf %91, %94 : vector<2x1xf32>
    %96 = math.rsqrt %95 : vector<2x1xf32>
    %97 = vector.broadcast %96 : vector<2x1xf32> to vector<2x128xf32>
    %98 = arith.mulf %93, %97 : vector<2x128xf32>
    %99 = vector.broadcast %79 : vector<1x128xf32> to vector<2x128xf32>
    %100 = arith.mulf %98, %99 : vector<2x128xf32>
    %101 = vector.broadcast %80 : vector<1x128xf32> to vector<2x128xf32>
    %102 = arith.addf %100, %101 : vector<2x128xf32>
    %c0_32 = arith.constant 0 : index
    %c0_33 = arith.constant 0 : index
    %103 = vector.load %arg8[%c0_32, %c0_33] : memref<128x256xi8, #tpu.memory_space<vmem>>, vector<128x256xi8>
    %104 = arith.sitofp %103 : vector<128x256xi8> to vector<128x256xf32>
    %105 = arith.truncf %104 : vector<128x256xf32> to vector<128x256xbf16>
    %106 = arith.truncf %102 : vector<2x128xf32> to vector<2x128xbf16>
    %cst_34 = arith.constant dense<0.000000e+00> : vector<2x256xf32>
    %107 = tpu.matmul %106, %105, %cst_34 {dimension_numbers = #tpu.dot_dimension_numbers<[1], [0], [0], [1], [0, 0, 1, 1], [], []>} : vector<2x128xbf16>, vector<128x256xbf16>, vector<2x256xf32> -> vector<2x256xf32>
    %108 = vector.extract_strided_slice %0 {offsets = [21, 0], sizes = [1, 256], strides = [1, 1]} : vector<27x256xf32> to vector<1x256xf32>
    %109 = vector.broadcast %108 : vector<1x256xf32> to vector<2x256xf32>
    %110 = arith.mulf %107, %109 : vector<2x256xf32>
    %111 = vector.extract_strided_slice %0 {offsets = [7, 0], sizes = [1, 256], strides = [1, 1]} : vector<27x256xf32> to vector<1x256xf32>
    %112 = vector.broadcast %111 : vector<1x256xf32> to vector<2x256xf32>
    %113 = arith.addf %110, %112 : vector<2x256xf32>
    %cst_35 = arith.constant 5.000000e-01 : f32
    %114 = vector.broadcast %cst_35 : f32 to vector<2x256xf32>
    %115 = arith.mulf %114, %113 : vector<2x256xf32>
    %cst_36 = arith.constant 4.471500e-02 : f32
    %116 = vector.broadcast %cst_36 : f32 to vector<2x256xf32>
    %117 = arith.mulf %116, %113 : vector<2x256xf32>
    %118 = arith.mulf %117, %113 : vector<2x256xf32>
    %119 = arith.mulf %118, %113 : vector<2x256xf32>
    %120 = arith.addf %113, %119 : vector<2x256xf32>
    %cst_37 = arith.constant 0.797884583 : f32
    %121 = vector.broadcast %cst_37 : f32 to vector<2x256xf32>
    %122 = arith.mulf %121, %120 : vector<2x256xf32>
    %123 = math.tanh %122 : vector<2x256xf32>
    %cst_38 = arith.constant 1.000000e+00 : f32
    %124 = vector.broadcast %cst_38 : f32 to vector<2x256xf32>
    %125 = arith.addf %124, %123 : vector<2x256xf32>
    %126 = arith.mulf %115, %125 : vector<2x256xf32>
    %127 = arith.addf %54, %126 : vector<2x256xf32>
    %128 = arith.addf %2, %127 : vector<2x256xf32>
    %129 = vector.extract_strided_slice %0 {offsets = [8, 0], sizes = [1, 256], strides = [1, 1]} : vector<27x256xf32> to vector<1x256xf32>
    %130 = vector.extract_strided_slice %0 {offsets = [9, 0], sizes = [1, 256], strides = [1, 1]} : vector<27x256xf32> to vector<1x256xf32>
    %cst_39 = arith.constant dense<0.000000e+00> : vector<2xf32>
    %131 = vector.multi_reduction <add>, %2, %cst_39 [1] : vector<2x256xf32> to vector<2xf32>
    %132 = vector.shape_cast %131 : vector<2xf32> to vector<2x1xf32>
    %cst_40 = arith.constant 2.560000e+02 : f32
    %133 = vector.broadcast %cst_40 : f32 to vector<2x1xf32>
    %134 = arith.divf %132, %133 : vector<2x1xf32>
    %135 = vector.broadcast %134 : vector<2x1xf32> to vector<2x256xf32>
    %136 = arith.subf %2, %135 : vector<2x256xf32>
    %137 = arith.mulf %136, %136 : vector<2x256xf32>
    %cst_41 = arith.constant dense<0.000000e+00> : vector<2xf32>
    %138 = vector.multi_reduction <add>, %137, %cst_41 [1] : vector<2x256xf32> to vector<2xf32>
    %139 = vector.shape_cast %138 : vector<2xf32> to vector<2x1xf32>
    %cst_42 = arith.constant 2.560000e+02 : f32
    %140 = vector.broadcast %cst_42 : f32 to vector<2x1xf32>
    %141 = arith.divf %139, %140 : vector<2x1xf32>
    %142 = vector.broadcast %134 : vector<2x1xf32> to vector<2x256xf32>
    %143 = arith.subf %2, %142 : vector<2x256xf32>
    %cst_43 = arith.constant 9.99999974E-6 : f32
    %144 = vector.broadcast %cst_43 : f32 to vector<2x1xf32>
    %145 = arith.addf %141, %144 : vector<2x1xf32>
    %146 = math.rsqrt %145 : vector<2x1xf32>
    %147 = vector.broadcast %146 : vector<2x1xf32> to vector<2x256xf32>
    %148 = arith.mulf %143, %147 : vector<2x256xf32>
    %149 = vector.broadcast %129 : vector<1x256xf32> to vector<2x256xf32>
    %150 = arith.mulf %148, %149 : vector<2x256xf32>
    %151 = vector.broadcast %130 : vector<1x256xf32> to vector<2x256xf32>
    %152 = arith.addf %150, %151 : vector<2x256xf32>
    %c0_44 = arith.constant 0 : index
    %c0_45 = arith.constant 0 : index
    %153 = vector.load %arg9[%c0_44, %c0_45] : memref<256x256xi8, #tpu.memory_space<vmem>>, vector<256x256xi8>
    %154 = arith.sitofp %153 : vector<256x256xi8> to vector<256x256xf32>
    %155 = arith.truncf %154 : vector<256x256xf32> to vector<256x256xbf16>
    %156 = arith.truncf %152 : vector<2x256xf32> to vector<2x256xbf16>
    %cst_46 = arith.constant dense<0.000000e+00> : vector<2x256xf32>
    %157 = tpu.matmul %156, %155, %cst_46 {dimension_numbers = #tpu.dot_dimension_numbers<[1], [0], [0], [1], [0, 0, 1, 1], [], []>} : vector<2x256xbf16>, vector<256x256xbf16>, vector<2x256xf32> -> vector<2x256xf32>
    %158 = vector.extract_strided_slice %0 {offsets = [22, 0], sizes = [1, 256], strides = [1, 1]} : vector<27x256xf32> to vector<1x256xf32>
    %159 = vector.broadcast %158 : vector<1x256xf32> to vector<2x256xf32>
    %160 = arith.mulf %157, %159 : vector<2x256xf32>
    %161 = vector.extract_strided_slice %0 {offsets = [10, 0], sizes = [1, 256], strides = [1, 1]} : vector<27x256xf32> to vector<1x256xf32>
    %162 = vector.broadcast %161 : vector<1x256xf32> to vector<2x256xf32>
    %163 = arith.addf %160, %162 : vector<2x256xf32>
    %c0_47 = arith.constant 0 : index
    %c0_48 = arith.constant 0 : index
    %164 = vector.load %arg10[%c0_47, %c0_48] : memref<256x128xi8, #tpu.memory_space<vmem>>, vector<256x128xi8>
    %165 = arith.sitofp %164 : vector<256x128xi8> to vector<256x128xf32>
    %166 = arith.truncf %165 : vector<256x128xf32> to vector<256x128xbf16>
    %167 = arith.truncf %163 : vector<2x256xf32> to vector<2x256xbf16>
    %cst_49 = arith.constant dense<0.000000e+00> : vector<2x128xf32>
    %168 = tpu.matmul %167, %166, %cst_49 {dimension_numbers = #tpu.dot_dimension_numbers<[1], [0], [0], [1], [0, 0, 1, 1], [], []>} : vector<2x256xbf16>, vector<256x128xbf16>, vector<2x128xf32> -> vector<2x128xf32>
    %169 = vector.extract_strided_slice %0 {offsets = [23, 0], sizes = [1, 128], strides = [1, 1]} : vector<27x256xf32> to vector<1x128xf32>
    %170 = vector.broadcast %169 : vector<1x128xf32> to vector<2x128xf32>
    %171 = arith.mulf %168, %170 : vector<2x128xf32>
    %172 = vector.extract_strided_slice %0 {offsets = [11, 0], sizes = [1, 128], strides = [1, 1]} : vector<27x256xf32> to vector<1x128xf32>
    %173 = vector.broadcast %172 : vector<1x128xf32> to vector<2x128xf32>
    %174 = arith.addf %171, %173 : vector<2x128xf32>
    %cst_50 = arith.constant 5.000000e-01 : f32
    %175 = vector.broadcast %cst_50 : f32 to vector<2x128xf32>
    %176 = arith.mulf %175, %174 : vector<2x128xf32>
    %cst_51 = arith.constant 4.471500e-02 : f32
    %177 = vector.broadcast %cst_51 : f32 to vector<2x128xf32>
    %178 = arith.mulf %177, %174 : vector<2x128xf32>
    %179 = arith.mulf %178, %174 : vector<2x128xf32>
    %180 = arith.mulf %179, %174 : vector<2x128xf32>
    %181 = arith.addf %174, %180 : vector<2x128xf32>
    %cst_52 = arith.constant 0.797884583 : f32
    %182 = vector.broadcast %cst_52 : f32 to vector<2x128xf32>
    %183 = arith.mulf %182, %181 : vector<2x128xf32>
    %184 = math.tanh %183 : vector<2x128xf32>
    %cst_53 = arith.constant 1.000000e+00 : f32
    %185 = vector.broadcast %cst_53 : f32 to vector<2x128xf32>
    %186 = arith.addf %185, %184 : vector<2x128xf32>
    %187 = arith.mulf %176, %186 : vector<2x128xf32>
    %188 = vector.extract_strided_slice %0 {offsets = [12, 0], sizes = [1, 128], strides = [1, 1]} : vector<27x256xf32> to vector<1x128xf32>
    %189 = vector.extract_strided_slice %0 {offsets = [13, 0], sizes = [1, 128], strides = [1, 1]} : vector<27x256xf32> to vector<1x128xf32>
    %cst_54 = arith.constant dense<0.000000e+00> : vector<2xf32>
    %190 = vector.multi_reduction <add>, %187, %cst_54 [1] : vector<2x128xf32> to vector<2xf32>
    %191 = vector.shape_cast %190 : vector<2xf32> to vector<2x1xf32>
    %cst_55 = arith.constant 1.280000e+02 : f32
    %192 = vector.broadcast %cst_55 : f32 to vector<2x1xf32>
    %193 = arith.divf %191, %192 : vector<2x1xf32>
    %194 = vector.broadcast %193 : vector<2x1xf32> to vector<2x128xf32>
    %195 = arith.subf %187, %194 : vector<2x128xf32>
    %196 = arith.mulf %195, %195 : vector<2x128xf32>
    %cst_56 = arith.constant dense<0.000000e+00> : vector<2xf32>
    %197 = vector.multi_reduction <add>, %196, %cst_56 [1] : vector<2x128xf32> to vector<2xf32>
    %198 = vector.shape_cast %197 : vector<2xf32> to vector<2x1xf32>
    %cst_57 = arith.constant 1.280000e+02 : f32
    %199 = vector.broadcast %cst_57 : f32 to vector<2x1xf32>
    %200 = arith.divf %198, %199 : vector<2x1xf32>
    %201 = vector.broadcast %193 : vector<2x1xf32> to vector<2x128xf32>
    %202 = arith.subf %187, %201 : vector<2x128xf32>
    %cst_58 = arith.constant 9.99999974E-6 : f32
    %203 = vector.broadcast %cst_58 : f32 to vector<2x1xf32>
    %204 = arith.addf %200, %203 : vector<2x1xf32>
    %205 = math.rsqrt %204 : vector<2x1xf32>
    %206 = vector.broadcast %205 : vector<2x1xf32> to vector<2x128xf32>
    %207 = arith.mulf %202, %206 : vector<2x128xf32>
    %208 = vector.broadcast %188 : vector<1x128xf32> to vector<2x128xf32>
    %209 = arith.mulf %207, %208 : vector<2x128xf32>
    %210 = vector.broadcast %189 : vector<1x128xf32> to vector<2x128xf32>
    %211 = arith.addf %209, %210 : vector<2x128xf32>
    %c0_59 = arith.constant 0 : index
    %c0_60 = arith.constant 0 : index
    %212 = vector.load %arg11[%c0_59, %c0_60] : memref<128x256xi8, #tpu.memory_space<vmem>>, vector<128x256xi8>
    %213 = arith.sitofp %212 : vector<128x256xi8> to vector<128x256xf32>
    %214 = arith.truncf %213 : vector<128x256xf32> to vector<128x256xbf16>
    %215 = arith.truncf %211 : vector<2x128xf32> to vector<2x128xbf16>
    %cst_61 = arith.constant dense<0.000000e+00> : vector<2x256xf32>
    %216 = tpu.matmul %215, %214, %cst_61 {dimension_numbers = #tpu.dot_dimension_numbers<[1], [0], [0], [1], [0, 0, 1, 1], [], []>} : vector<2x128xbf16>, vector<128x256xbf16>, vector<2x256xf32> -> vector<2x256xf32>
    %217 = vector.extract_strided_slice %0 {offsets = [24, 0], sizes = [1, 256], strides = [1, 1]} : vector<27x256xf32> to vector<1x256xf32>
    %218 = vector.broadcast %217 : vector<1x256xf32> to vector<2x256xf32>
    %219 = arith.mulf %216, %218 : vector<2x256xf32>
    %220 = vector.extract_strided_slice %0 {offsets = [14, 0], sizes = [1, 256], strides = [1, 1]} : vector<27x256xf32> to vector<1x256xf32>
    %221 = vector.broadcast %220 : vector<1x256xf32> to vector<2x256xf32>
    %222 = arith.addf %219, %221 : vector<2x256xf32>
    %cst_62 = arith.constant 5.000000e-01 : f32
    %223 = vector.broadcast %cst_62 : f32 to vector<2x256xf32>
    %224 = arith.mulf %223, %222 : vector<2x256xf32>
    %cst_63 = arith.constant 4.471500e-02 : f32
    %225 = vector.broadcast %cst_63 : f32 to vector<2x256xf32>
    %226 = arith.mulf %225, %222 : vector<2x256xf32>
    %227 = arith.mulf %226, %222 : vector<2x256xf32>
    %228 = arith.mulf %227, %222 : vector<2x256xf32>
    %229 = arith.addf %222, %228 : vector<2x256xf32>
    %cst_64 = arith.constant 0.797884583 : f32
    %230 = vector.broadcast %cst_64 : f32 to vector<2x256xf32>
    %231 = arith.mulf %230, %229 : vector<2x256xf32>
    %232 = math.tanh %231 : vector<2x256xf32>
    %cst_65 = arith.constant 1.000000e+00 : f32
    %233 = vector.broadcast %cst_65 : f32 to vector<2x256xf32>
    %234 = arith.addf %233, %232 : vector<2x256xf32>
    %235 = arith.mulf %224, %234 : vector<2x256xf32>
    %236 = arith.addf %163, %235 : vector<2x256xf32>
    %237 = arith.addf %19, %236 : vector<2x256xf32>
    %c0_66 = arith.constant 0 : index
    %c0_67 = arith.constant 0 : index
    %238 = vector.load %arg12[%c0_66, %c0_67] : memref<256x256xi8, #tpu.memory_space<vmem>>, vector<256x256xi8>
    %239 = arith.sitofp %238 : vector<256x256xi8> to vector<256x256xf32>
    %240 = arith.truncf %239 : vector<256x256xf32> to vector<256x256xbf16>
    %241 = arith.truncf %128 : vector<2x256xf32> to vector<2x256xbf16>
    %cst_68 = arith.constant dense<0.000000e+00> : vector<2x256xf32>
    %242 = tpu.matmul %241, %240, %cst_68 {dimension_numbers = #tpu.dot_dimension_numbers<[1], [0], [0], [1], [0, 0, 1, 1], [], []>} : vector<2x256xbf16>, vector<256x256xbf16>, vector<2x256xf32> -> vector<2x256xf32>
    %243 = vector.extract_strided_slice %0 {offsets = [25, 0], sizes = [1, 256], strides = [1, 1]} : vector<27x256xf32> to vector<1x256xf32>
    %244 = vector.broadcast %243 : vector<1x256xf32> to vector<2x256xf32>
    %245 = arith.mulf %242, %244 : vector<2x256xf32>
    %246 = vector.extract_strided_slice %0 {offsets = [15, 0], sizes = [1, 256], strides = [1, 1]} : vector<27x256xf32> to vector<1x256xf32>
    %247 = vector.broadcast %246 : vector<1x256xf32> to vector<2x256xf32>
    %248 = arith.addf %245, %247 : vector<2x256xf32>
    %cst_69 = arith.constant 0.000000e+00 : f32
    %249 = vector.broadcast %cst_69 : f32 to vector<2x256xf32>
    %250 = arith.maximumf %248, %249 : vector<2x256xf32>
    %c0_70 = arith.constant 0 : index
    %c0_71 = arith.constant 0 : index
    %251 = vector.load %arg13[%c0_70, %c0_71] : memref<256x256xi8, #tpu.memory_space<vmem>>, vector<256x256xi8>
    %252 = arith.sitofp %251 : vector<256x256xi8> to vector<256x256xf32>
    %253 = arith.truncf %252 : vector<256x256xf32> to vector<256x256xbf16>
    %254 = arith.truncf %237 : vector<2x256xf32> to vector<2x256xbf16>
    %cst_72 = arith.constant dense<0.000000e+00> : vector<2x256xf32>
    %255 = tpu.matmul %254, %253, %cst_72 {dimension_numbers = #tpu.dot_dimension_numbers<[1], [0], [0], [1], [0, 0, 1, 1], [], []>} : vector<2x256xbf16>, vector<256x256xbf16>, vector<2x256xf32> -> vector<2x256xf32>
    %256 = vector.extract_strided_slice %0 {offsets = [26, 0], sizes = [1, 256], strides = [1, 1]} : vector<27x256xf32> to vector<1x256xf32>
    %257 = vector.broadcast %256 : vector<1x256xf32> to vector<2x256xf32>
    %258 = arith.mulf %255, %257 : vector<2x256xf32>
    %259 = vector.extract_strided_slice %0 {offsets = [16, 0], sizes = [1, 256], strides = [1, 1]} : vector<27x256xf32> to vector<1x256xf32>
    %260 = vector.broadcast %259 : vector<1x256xf32> to vector<2x256xf32>
    %261 = arith.addf %258, %260 : vector<2x256xf32>
    %cst_73 = arith.constant 0.000000e+00 : f32
    %262 = vector.broadcast %cst_73 : f32 to vector<2x256xf32>
    %263 = arith.maximumf %261, %262 : vector<2x256xf32>
    %264 = arith.addf %250, %263 : vector<2x256xf32>
    %265 = arith.truncf %264 : vector<2x256xf32> to vector<2x256xbf16>
    %c0_74 = arith.constant 0 : index
    %c0_75 = arith.constant 0 : index
    %266 = vector.load %arg14[%c0_74, %c0_75] : memref<256x8xbf16, #tpu.memory_space<vmem>>, vector<256x8xbf16>
    %cst_76 = arith.constant dense<0.000000e+00> : vector<2x8xf32>
    %267 = tpu.matmul %265, %266, %cst_76 {dimension_numbers = #tpu.dot_dimension_numbers<[1], [0], [0], [1], [0, 0, 1, 1], [], []>} : vector<2x256xbf16>, vector<256x8xbf16>, vector<2x8xf32> -> vector<2x8xf32>
    %268 = vector.extract_strided_slice %0 {offsets = [17, 0], sizes = [1, 256], strides = [1, 1]} : vector<27x256xf32> to vector<1x256xf32>
    %269 = vector.extract_strided_slice %268 {offsets = [0, 0], sizes = [1, 8], strides = [1, 1]} : vector<1x256xf32> to vector<1x8xf32>
    %270 = vector.broadcast %269 : vector<1x8xf32> to vector<2x8xf32>
    %271 = arith.addf %267, %270 : vector<2x8xf32>
    %c0_77 = arith.constant 0 : index
    %c0_78 = arith.constant 0 : index
    %272 = vector.load %arg15[%c0_77, %c0_78] : memref<2x8xf32, #tpu.memory_space<vmem>>, vector<2x8xf32>
    tpu.vector_store %arg15[%c0_77, %c0_78], %271 {strides = array<i32>} : memref<2x8xf32, #tpu.memory_space<vmem>>, vector<2x8xf32>,
    return
  }
  func.func @transform_0(%arg0: i32) -> (i32, i32) {
    %c0_i32 = arith.constant 0 : i32
    %c0_i32_0 = arith.constant 0 : i32
    return %arg0, %c0_i32 : i32, i32
  }
  func.func @transform_1(%arg0: i32) -> (i32, i32, i32) {
    %c0_i32 = arith.constant 0 : i32
    %c0_i32_0 = arith.constant 0 : i32
    %c0_i32_1 = arith.constant 0 : i32
    return %arg0, %c0_i32, %c0_i32_0 : i32, i32, i32
  }
  func.func @transform_2(%arg0: i32) -> (i32, i32, i32) {
    %c0_i32 = arith.constant 0 : i32
    %c0_i32_0 = arith.constant 0 : i32
    %c0_i32_1 = arith.constant 0 : i32
    %c0_i32_2 = arith.constant 0 : i32
    return %c0_i32, %c0_i32_0, %c0_i32_1 : i32, i32, i32
  }
  func.func @transform_3(%arg0: i32) -> (i32, i32) {
    %c0_i32 = arith.constant 0 : i32
    %c0_i32_0 = arith.constant 0 : i32
    %c0_i32_1 = arith.constant 0 : i32
    return %c0_i32, %c0_i32_0 : i32, i32
  }
  func.func @transform_4(%arg0: i32) -> (i32, i32) {
    %c0_i32 = arith.constant 0 : i32
    %c0_i32_0 = arith.constant 0 : i32
    %c0_i32_1 = arith.constant 0 : i32
    return %c0_i32, %c0_i32_0 : i32, i32
  }
  func.func @transform_5(%arg0: i32) -> (i32, i32) {
    %c0_i32 = arith.constant 0 : i32
    %c0_i32_0 = arith.constant 0 : i32
    %c0_i32_1 = arith.constant 0 : i32
    return %c0_i32, %c0_i32_0 : i32, i32
  }
  func.func @transform_6(%arg0: i32) -> (i32, i32) {
    %c0_i32 = arith.constant 0 : i32
    %c0_i32_0 = arith.constant 0 : i32
    %c0_i32_1 = arith.constant 0 : i32
    return %c0_i32, %c0_i32_0 : i32, i32
  }
  func.func @transform_7(%arg0: i32) -> (i32, i32) {
    %c0_i32 = arith.constant 0 : i32
    %c0_i32_0 = arith.constant 0 : i32
    %c0_i32_1 = arith.constant 0 : i32
    return %c0_i32, %c0_i32_0 : i32, i32
  }
  func.func @transform_8(%arg0: i32) -> (i32, i32) {
    %c0_i32 = arith.constant 0 : i32
    %c0_i32_0 = arith.constant 0 : i32
    %c0_i32_1 = arith.constant 0 : i32
    return %c0_i32, %c0_i32_0 : i32, i32
  }
  func.func @transform_9(%arg0: i32) -> (i32, i32) {
    %c0_i32 = arith.constant 0 : i32
    %c0_i32_0 = arith.constant 0 : i32
    %c0_i32_1 = arith.constant 0 : i32
    return %c0_i32, %c0_i32_0 : i32, i32
  }
  func.func @transform_10(%arg0: i32) -> (i32, i32) {
    %c0_i32 = arith.constant 0 : i32
    %c0_i32_0 = arith.constant 0 : i32
    %c0_i32_1 = arith.constant 0 : i32
    return %c0_i32, %c0_i32_0 : i32, i32
  }
  func.func @transform_11(%arg0: i32) -> (i32, i32) {
    %c0_i32 = arith.constant 0 : i32
    %c0_i32_0 = arith.constant 0 : i32
    %c0_i32_1 = arith.constant 0 : i32
    return %c0_i32, %c0_i32_0 : i32, i32
  }
  func.func @transform_12(%arg0: i32) -> (i32, i32) {
    %c0_i32 = arith.constant 0 : i32
    %c0_i32_0 = arith.constant 0 : i32
    %c0_i32_1 = arith.constant 0 : i32
    return %c0_i32, %c0_i32_0 : i32, i32
  }
  func.func @transform_13(%arg0: i32) -> (i32, i32) {
    %c0_i32 = arith.constant 0 : i32
    %c0_i32_0 = arith.constant 0 : i32
    %c0_i32_1 = arith.constant 0 : i32
    return %c0_i32, %c0_i32_0 : i32, i32
  }
  func.func @transform_14(%arg0: i32) -> (i32, i32) {
    %c0_i32 = arith.constant 0 : i32
    %c0_i32_0 = arith.constant 0 : i32
    return %arg0, %c0_i32 : i32, i32
  }
}

</mosaic_0001>

<bundles_post_ra>
// kernel: _forward.1
= control target key start
LH: loop header
LB: loop body
LE: loop exit
PB: predicated region body
PF: predicated region fallthrough
CT: control target
= control target key end

     0   :  { %19 = vsyncpa [#allocation3], 0  ;;  %s2455_s0 = inlined_call_operand.vmem [shape: bf16[2,256], index: 0, kind: input, shape index: {}]   ;;  %s2456_s1 = inlined_call_operand.vmem [shape: bf16[2,4,128], index: 1, kind: input, shape index: {}]   ;;  %s2457_s2 = inlined_call_operand.vmem [shape: f32[1,4,1], index: 2, kind: input, shape index: {}]   ;;  %s2458_s3 = inlined_call_operand.vmem [shape: f32[27,256], index: 3, kind: input, shape index: {}]   ;;  %s2459_s4 = inlined_call_operand.hbm [shape: s8[128,256], index: 4, kind: input, shape index: {}]   ;;  %s2460_s5 = inlined_call_operand.vmem [shape: s8[256,256], index: 5, kind: input, shape index: {}]   ;;  %s2461_s6 = inlined_call_operand.hbm [shape: s8[256,128], index: 6, kind: input, shape index: {}]   ;;  %s2462_s7 = inlined_call_operand.hbm [shape: s8[128,256], index: 7, kind: input, shape index: {}]   ;;  %s2463_s8 = inlined_call_operand.hbm [shape: s8[256,256], index: 8, kind: input, shape index: {}]   ;;  %s2464_s9 = inlined_call_operand.hbm [shape: s8[256,128], index: 9, kind: input, shape index: {}]   ;;  %s2465_s10 = inlined_call_operand.hbm [shape: s8[128,256], index: 10, kind: input, shape index: {}]   ;;  %s2466_s11 = inlined_call_operand.hbm [shape: s8[256,256], index: 11, kind: input, shape index: {}]   ;;  %s2467_s12 = inlined_call_operand.hbm [shape: s8[256,256], index: 12, kind: input, shape index: {}]   ;;  %s2468_s13 = inlined_call_operand.vmem [shape: bf16[256,8], index: 13, kind: input, shape index: {}]   ;;  %s2469_s14 = inlined_call_operand.vmem [shape: f32[2,8], index: 14, kind: output, shape index: {}]  }
   0x1   :  { %20 = vsyncpa [#allocation5], 0 }
   0x2   :  { %21 = vsyncpa [#allocation8], 0 }
   0x3   :  { %22 = vsyncpa [#allocation11], 0 }
   0x4   :  { %23 = vsyncpa [#allocation14], 0  ;;  %s1854_s29 = smov [#allocation4]   ;;  %s1668_s17 = scalar_lea.hbm %s2461_s6, 1024 }
   0x5   :  { %s51_s30 = sshll.u32 %s1854_s29, 4  ;;  %p1669_p0 = scmp.ne.s32.totalorder %s2461_s6, %s1668_s17  ;;  %s52_s30 = int_to_ptr.vmem [resolvable:$true] %s51_s30 }
   0x6   :  { %p1672_p1 = scmp.lt.u32.totalorder %s1668_s17, %s2461_s6 }
   0x8   :  { %p1674_p2 = pnand %p1672_p1, %p1669_p0 }
   0xa   :  { %1677 = shalt.err (!%p1674_p2)
}
   0xb   :  { %s1678_s22 = scalar_lea.vmem %s52_s30, 1024  ;;  %p1683_p4 = scmp.lt.s32.totalorder %s52_s30, %s52_s30 }
   0xc   :  { %p1679_p3 = scmp.ne.s32.totalorder %s52_s30, %s1678_s22  ;;  %p1684_p5 = scmp.lt.s32.totalorder %s1678_s22, %s1678_s22 }
   0xe   :  { %p1685_p6 = por %p1684_p5, %p1683_p4 }
  0x10   :  { %p1686_p7 = pnand %p1685_p6, %p1679_p3 }
  0x12   :  { %1689 = shalt.err (!%p1686_p7)
}
  0x13   :  { %s1855_s23 = smov 128   ;;  %s1856_s24 = smov 8  }
  0x14   :  { %57 = dma.hbm_to_vmem [thread:$0]  %s2461_s6, 1024, %s52_s30, [#allocation5], %s1855_s23, %s1855_s23, %s1856_s24  }
  0x15   :  { %s1857_s27 = smov [#allocation7]   ;;  %s1858_s29 = smov [#allocation10]  }
  0x16   :  { %s75_s28 = sshll.u32 %s1857_s27, 4  ;;  %s99_s15 = sshll.u32 %s1858_s29, 4  ;;  %s76_s28 = int_to_ptr.vmem [resolvable:$true] %s75_s28  ;;  %s100_s15 = int_to_ptr.vmem [resolvable:$true] %s99_s15 }
  0x17   :  { %s1690_s18 = scalar_lea.hbm %s2463_s8, 2048 }
  0x18   :  { %p1691_p8 = scmp.ne.s32.totalorder %s2463_s8, %s1690_s18  ;;  %p1694_p9 = scmp.lt.u32.totalorder %s1690_s18, %s2463_s8 }
  0x1a   :  { %p1696_p10 = pnand %p1694_p9, %p1691_p8 }
  0x1c   :  { %1699 = shalt.err (!%p1696_p10)
}
  0x1d   :  { %s1700_s6 = scalar_lea.vmem %s76_s28, 2048  ;;  %p1705_p12 = scmp.lt.s32.totalorder %s76_s28, %s76_s28 }
  0x1e   :  { %p1701_p11 = scmp.ne.s32.totalorder %s76_s28, %s1700_s6  ;;  %p1706_p13 = scmp.lt.s32.totalorder %s1700_s6, %s1700_s6 }
  0x20   :  { %p1707_p0 = por %p1706_p13, %p1705_p12 }
  0x22   :  { %p1708_p1 = pnand %p1707_p0, %p1701_p11 }
  0x24   :  { %1711 = shalt.err (!%p1708_p1)
}
  0x25   :  { %s1859_s30 = smov 256   ;;  %s1860_s25 = smov 16  }
  0x26   :  { %81 = dma.hbm_to_vmem [thread:$0]  %s2463_s8, 2048, %s76_s28, [#allocation8], %s1859_s30, %s1859_s30, %s1860_s25  }
  0x27   :  { %s1712_s17 = scalar_lea.hbm %s2465_s10, 1024 }
  0x28   :  { %p1713_p2 = scmp.ne.s32.totalorder %s2465_s10, %s1712_s17  ;;  %p1716_p3 = scmp.lt.u32.totalorder %s1712_s17, %s2465_s10 }
  0x2a   :  { %p1718_p4 = pnand %p1716_p3, %p1713_p2 }
  0x2c   :  { %1721 = shalt.err (!%p1718_p4)
}
  0x2d   :  { %s1722_s22 = scalar_lea.vmem %s100_s15, 1024  ;;  %p1727_p6 = scmp.lt.s32.totalorder %s100_s15, %s100_s15 }
  0x2e   :  { %p1723_p5 = scmp.ne.s32.totalorder %s100_s15, %s1722_s22  ;;  %p1728_p7 = scmp.lt.s32.totalorder %s1722_s22, %s1722_s22 }
  0x30   :  { %p1729_p8 = por %p1728_p7, %p1727_p6 }
  0x32   :  { %p1730_p9 = pnand %p1729_p8, %p1723_p5 }
  0x34   :  { %1733 = shalt.err (!%p1730_p9)
}
  0x35   :  { %105 = dma.hbm_to_vmem [thread:$0]  %s2465_s10, 1024, %s100_s15, [#allocation11], %s1859_s30, %s1859_s30, %s1860_s25  }
  0x36   :  { %s1861_s6 = smov [#allocation2]   ;;  %s1862_s27 = smov [#allocation6]  }
  0x37   :  { %s37_s26 = sshll.u32 %s1861_s6, 4  ;;  %s63_s29 = sshll.u32 %s1862_s27, 4  ;;  %s38_s26 = int_to_ptr.vmem [resolvable:$true] %s37_s26  ;;  %s64_s29 = int_to_ptr.vmem [resolvable:$true] %s63_s29 }
  0x38   :  { %s1734_s18 = scalar_lea.hbm %s2459_s4, 1024 }
  0x39   :  { %p1735_p10 = scmp.ne.s32.totalorder %s2459_s4, %s1734_s18  ;;  %p1738_p11 = scmp.lt.u32.totalorder %s1734_s18, %s2459_s4 }
  0x3b   :  { %p1740_p12 = pnand %p1738_p11, %p1735_p10 }
  0x3d   :  { %1743 = shalt.err (!%p1740_p12)
}
  0x3e   :  { %s1744_s10 = scalar_lea.vmem %s38_s26, 1024  ;;  %p1749_p0 = scmp.lt.s32.totalorder %s38_s26, %s38_s26 }
  0x3f   :  { %p1745_p13 = scmp.ne.s32.totalorder %s38_s26, %s1744_s10  ;;  %p1750_p1 = scmp.lt.s32.totalorder %s1744_s10, %s1744_s10 }
  0x41   :  { %p1751_p2 = por %p1750_p1, %p1749_p0 }
  0x43   :  { %p1752_p3 = pnand %p1751_p2, %p1745_p13 }
  0x45   :  { %1755 = shalt.err (!%p1752_p3)
}
  0x46   :  { %43 = dma.hbm_to_vmem [thread:$0]  %s2459_s4, 1024, %s38_s26, [#allocation3], %s1859_s30, %s1859_s30, %s1860_s25  }
  0x47   :  { %s1756_s27 = scalar_lea.hbm %s2462_s7, 1024 }
  0x48   :  { %p1757_p4 = scmp.ne.s32.totalorder %s2462_s7, %s1756_s27  ;;  %p1760_p5 = scmp.lt.u32.totalorder %s1756_s27, %s2462_s7 }
  0x4a   :  { %p1762_p6 = pnand %p1760_p5, %p1757_p4 }
  0x4c   :  { %1765 = shalt.err (!%p1762_p6)
}
  0x4d   :  { %s1766_s20 = scalar_lea.vmem %s64_s29, 1024  ;;  %p1771_p8 = scmp.lt.s32.totalorder %s64_s29, %s64_s29 }
  0x4e   :  { %p1767_p7 = scmp.ne.s32.totalorder %s64_s29, %s1766_s20  ;;  %p1772_p9 = scmp.lt.s32.totalorder %s1766_s20, %s1766_s20 }
  0x50   :  { %p1773_p10 = por %p1772_p9, %p1771_p8 }
  0x52   :  { %p1774_p11 = pnand %p1773_p10, %p1767_p7 }
  0x54   :  { %1777 = shalt.err (!%p1774_p11)
}
  0x55   :  { %69 = dma.hbm_to_vmem [thread:$0]  %s2462_s7, 1024, %s64_s29, [#allocation5], %s1859_s30, %s1859_s30, %s1860_s25  }
  0x56   :  { %s1863_s21 = smov [#allocation9]   ;;  %s1864_s10 = smov [#allocation12]  }
  0x57   :  { %s87_s22 = sshll.u32 %s1863_s21, 4  ;;  %s111_s15 = sshll.u32 %s1864_s10, 4  ;;  %s88_s22 = int_to_ptr.vmem [resolvable:$true] %s87_s22  ;;  %s112_s15 = int_to_ptr.vmem [resolvable:$true] %s111_s15 }
  0x58   :  { %s1778_s6 = scalar_lea.hbm %s2464_s9, 1024 }
  0x59   :  { %p1779_p12 = scmp.ne.s32.totalorder %s2464_s9, %s1778_s6  ;;  %p1782_p13 = scmp.lt.u32.totalorder %s1778_s6, %s2464_s9 }
  0x5b   :  { %p1784_p0 = pnand %p1782_p13, %p1779_p12 }
  0x5d   :  { %1787 = shalt.err (!%p1784_p0)
}
  0x5e   :  { %s1788_s7 = scalar_lea.vmem %s88_s22, 1024  ;;  %p1793_p2 = scmp.lt.s32.totalorder %s88_s22, %s88_s22 }
  0x5f   :  { %p1789_p1 = scmp.ne.s32.totalorder %s88_s22, %s1788_s7  ;;  %p1794_p3 = scmp.lt.s32.totalorder %s1788_s7, %s1788_s7 }
  0x61   :  { %p1795_p4 = por %p1794_p3, %p1793_p2 }
  0x63   :  { %p1796_p5 = pnand %p1795_p4, %p1789_p1 }
  0x65   :  { %1799 = shalt.err (!%p1796_p5)
}
  0x66   :  { %93 = dma.hbm_to_vmem [thread:$0]  %s2464_s9, 1024, %s88_s22, [#allocation8], %s1855_s23, %s1855_s23, %s1856_s24  }
  0x67   :  { %s1800_s26 = scalar_lea.hbm %s2466_s11, 2048 }
  0x68   :  { %p1801_p6 = scmp.ne.s32.totalorder %s2466_s11, %s1800_s26  ;;  %p1804_p7 = scmp.lt.u32.totalorder %s1800_s26, %s2466_s11 }
  0x6a   :  { %p1806_p8 = pnand %p1804_p7, %p1801_p6 }
  0x6c   :  { %1809 = shalt.err (!%p1806_p8)
}
  0x6d   :  { %s1810_s6 = scalar_lea.vmem %s112_s15, 2048  ;;  %p1815_p10 = scmp.lt.s32.totalorder %s112_s15, %s112_s15 }
  0x6e   :  { %p1811_p9 = scmp.ne.s32.totalorder %s112_s15, %s1810_s6  ;;  %p1816_p11 = scmp.lt.s32.totalorder %s1810_s6, %s1810_s6 }
  0x70   :  { %p1817_p12 = por %p1816_p11, %p1815_p10 }
  0x72   :  { %p1818_p13 = pnand %p1817_p12, %p1811_p9 }
  0x74   :  { %1821 = shalt.err (!%p1818_p13)
}
  0x75   :  { %117 = dma.hbm_to_vmem [thread:$0]  %s2466_s11, 2048, %s112_s15, [#allocation11], %s1859_s30, %s1859_s30, %s1860_s25  }
  0x76   :  { %s1865_s24 = smov [#allocation13]   ;;  %s1822_s17 = scalar_lea.hbm %s2467_s12, 2048 }
  0x77   :  { %s123_s22 = sshll.u32 %s1865_s24, 4  ;;  %p1823_p0 = scmp.ne.s32.totalorder %s2467_s12, %s1822_s17  ;;  %s124_s22 = int_to_ptr.vmem [resolvable:$true] %s123_s22 }
  0x78   :  { %p1826_p1 = scmp.lt.u32.totalorder %s1822_s17, %s2467_s12 }
  0x7a   :  { %p1828_p2 = pnand %p1826_p1, %p1823_p0 }
  0x7c   :  { %1831 = shalt.err (!%p1828_p2)
}
  0x7d   :  { %s1832_s20 = scalar_lea.vmem %s124_s22, 2048  ;;  %p1837_p4 = scmp.lt.s32.totalorder %s124_s22, %s124_s22 }
  0x7e   :  { %p1833_p3 = scmp.ne.s32.totalorder %s124_s22, %s1832_s20  ;;  %p1838_p5 = scmp.lt.s32.totalorder %s1832_s20, %s1832_s20 }
  0x80   :  { %p1839_p6 = por %p1838_p5, %p1837_p4 }
  0x82   :  { %p1840_p7 = pnand %p1839_p6, %p1833_p3 }
  0x84   :  { %1843 = shalt.err (!%p1840_p7)
}
  0x85   :  { %129 = dma.hbm_to_vmem [thread:$0]  %s2467_s12, 2048, %s124_s22, [#allocation14], %s1859_s30, %s1859_s30, %s1860_s25  }
  0x86   :  { %1844 = dma.done.wait [#allocation3], 1024  }
  0x87   :  { %1845 = vsyncadd [#allocation3], 4294966272 }
  0x88   :  { %1846 = dma.done.wait [#allocation5], 2048  }
  0x89   :  { %1847 = vsyncadd [#allocation5], 4294965248 }
  0x8a   :  { %1848 = dma.done.wait [#allocation8], 3072  }
  0x8b   :  { %1849 = vsyncadd [#allocation8], 4294964224 }
  0x8c   :  { %1850 = dma.done.wait [#allocation11], 3072  }
  0x8d   :  { %1851 = vsyncadd [#allocation11], 4294964224 }
  0x8e   :  { %1852 = dma.done.wait [#allocation14], 2048  }
  0x8f   :  { %1853 = vsyncadd [#allocation14], 4294965248  ;;  %v1866_v0 = vmov 0   ;;  %v171_v1 = vld [vmem:[%s2457_s2] sm:$0xf]  ;;  %v195_v2 = vld [vmem:[#allocation2 + $0x8] sm:$0xff]  ;;  %v269_v53 = vlaneseq }
  0x90   :  { %1625 = vset.pattern.permute.xlu0 %v1866_v0  ;;  %260 = vmatprep.mubr.bf16.mxu0 %v1866_v0  ;;  %v194_v3 = vld [vmem:[#allocation2] sm:$0xff]  ;;  %v203_v4 = vunpack.c.l.s8.bf16 %v195_v2  ;;  %v205_v5 = vunpack.c.h.s8.bf16 %v195_v2  ;;  %v197_v7 = vld [vmem:[#allocation2 + $0x18] sm:$0xff]  ;;  %v196_v10 = vld [vmem:[#allocation2 + $0x10] sm:$0xff]  ;;  %vm179_vm0 = vcmask 1043456   ;;  %vm224_vm1 = vcmask 1041409  }
  0x91   :  { %174 = vperm.xlu0 %1625, %v171_v1   ;;  %v202_v6 = vunpack.c.l.s8.bf16 %v194_v3  ;;  %v204_v8 = vunpack.c.h.s8.bf16 %v194_v3  ;;  %v207_v9 = vunpack.c.l.s8.bf16 %v197_v7  ;;  %v206_v11 = vunpack.c.l.s8.bf16 %v196_v10  ;;  %v199_v12 = vld [vmem:[#allocation2 + $0x28] sm:$0xff]  ;;  %v198_v16 = vld [vmem:[#allocation2 + $0x20] sm:$0xff]  ;;  %v201_v19 = vld [vmem:[#allocation2 + $0x38] sm:$0xff] }
  0x92   :  { %228 = vmatprep.subr.bf16.mxu0 %v203_v4  ;;  %v209_v13 = vunpack.c.h.s8.bf16 %v197_v7  ;;  %v208_v14 = vunpack.c.h.s8.bf16 %v196_v10  ;;  %v211_v15 = vunpack.c.l.s8.bf16 %v199_v12  ;;  %v210_v17 = vunpack.c.l.s8.bf16 %v198_v16  ;;  %v200_v22 = vld [vmem:[#allocation2 + $0x30] sm:$0xff]  ;;  %v167_v26 = vld [vmem:[%s2456_s1] sm:$0x3]  ;;  %v168_v27 = vld [vmem:[%s2456_s1 + $0x2] sm:$0x3] }
  0x93   :  { %229 = vmatpush1.bf16.msra.mxu0 %v202_v6  ;;  %v213_v18 = vunpack.c.h.s8.bf16 %v199_v12  ;;  %v212_v20 = vunpack.c.h.s8.bf16 %v198_v16  ;;  %v215_v21 = vunpack.c.l.s8.bf16 %v201_v19  ;;  %v214_v23 = vunpack.c.l.s8.bf16 %v200_v22  ;;  %v2083_v56 = vld [vmem:[%s2458_s3 + $0x20] sm:$0xff]  ;;  %v2091_v58 = vld [vmem:[%s2458_s3 + $0x28] sm:$0xff] }
  0x94   :  { %230 = vmatprep.subr.bf16.mxu0 %v205_v5  ;;  %v217_v24 = vunpack.c.h.s8.bf16 %v201_v19  ;;  %v216_v25 = vunpack.c.h.s8.bf16 %v200_v22  ;;  %v169_v28 = vunpack.c.l.bf16 %v167_v26  ;;  %v170_v29 = vunpack.c.l.bf16 %v168_v27  ;;  %v2096_v59 = vld [vmem:[%s2458_s3] sm:$0xff]  ;;  %v2103_v61 = vld [vmem:[%s2458_s3 + $0x8] sm:$0xff] }
  0x95   :  { %v2075_v54 = vshrl.u32 %v269_v53, 7  ;;  %vm289_vm2 = vcmask 1041408   ;;  %v335_v27 = vld [vmem:[%s2460_s5 + $0x20] sm:$0xff]  ;;  %vm1517_vm3 = vcmask 58368  }
  0x97   :  { %231 = vmatpush1.bf16.msra.mxu0 %v204_v8  ;;  %v2078_v55 = vsub.s32 2, %v2075_v54  ;;  %v2086_v57 = vsub.s32 0, %v2075_v54 }
  0x98   :  { %232 = vmatprep.subr.bf16.mxu0 %v207_v9 }
  0x99   :  { %v272_v60 = vrot.slane %v2083_v56, %v2078_v55  ;;  %v276_v62 = vrot.slane %v2091_v58, %v2078_v55  ;;  %v282_v63 = vrot.slane %v2096_v59, %v2086_v57  ;;  %v286_v2 = vrot.slane %v2103_v61, %v2086_v57 }
  0x9b   :  { %233 = vmatpush1.bf16.msra.mxu0 %v206_v11 }
  0x9c   :  { %234 = vmatprep.subr.bf16.mxu0 %v209_v13  ;;  %v332_v13 = vld [vmem:[%s2460_s5 + $0x8] sm:$0xff] }
  0x9d   :  { %v350_v16 = vunpack.c.h.s8.bf16 %v332_v13 }
  0x9f   :  { %235 = vmatpush1.bf16.msra.mxu0 %v208_v14  ;;  %v331_v14 = vld [vmem:[%s2460_s5] sm:$0xff] }
  0xa0   :  { %236 = vmatprep.subr.bf16.mxu0 %v211_v15  ;;  %v348_v15 = vunpack.c.l.s8.bf16 %v332_v13  ;;  %v349_v19 = vunpack.c.h.s8.bf16 %v331_v14 }
  0xa2   :  { %381 = vmatprep.subr.bf16.mxu1 %v348_v15 }
  0xa3   :  { %237 = vmatpush1.bf16.msra.mxu0 %v210_v17  ;;  %v347_v17 = vunpack.c.l.s8.bf16 %v331_v14 }
  0xa4   :  { %238 = vmatprep.subr.bf16.mxu0 %v213_v18  ;;  %v334_v18 = vld [vmem:[%s2460_s5 + $0x18] sm:$0xff] }
  0xa5   :  { %382 = vmatpush1.bf16.msra.mxu1 %v347_v17  ;;  %v446_v17 = vld [vmem:[#allocation4 + $0x20] sm:$0xff] }
  0xa6   :  { %383 = vmatprep.subr.bf16.mxu1 %v350_v16  ;;  %v165_v16 = vld [vmem:[%s2455_s0] sm:$0x3] }
  0xa7   :  { %239 = vmatpush1.bf16.msra.mxu0 %v212_v20  ;;  %v352_v20 = vunpack.c.l.s8.bf16 %v334_v18 }
  0xa8   :  { %240 = vmatprep.subr.bf16.mxu0 %v215_v21  ;;  %v333_v21 = vld [vmem:[%s2460_s5 + $0x10] sm:$0xff] }
  0xa9   :  { %384 = vmatpush1.bf16.msra.mxu1 %v349_v19  ;;  %v351_v22 = vunpack.c.l.s8.bf16 %v333_v21  ;;  %v1867_v19 = vmov 1983009808  }
  0xaa   :  { %385 = vmatprep.subr.bf16.mxu1 %v352_v20  ;;  %v661_v20 = vunpack.c.l.s4 %v1867_v19 }
  0xab   :  { %241 = vmatpush1.bf16.msra.mxu0 %v214_v23  ;;  %v354_v23 = vunpack.c.h.s8.bf16 %v334_v18  ;;  %v442_v18 = vld [vmem:[#allocation4] sm:$0xff] }
  0xac   :  { %242 = vmatprep.subr.bf16.mxu0 %v217_v24  ;;  %v336_v24 = vld [vmem:[%s2460_s5 + $0x28] sm:$0xff] }
  0xad   :  { %386 = vmatpush1.bf16.msra.mxu1 %v351_v22  ;;  %v356_v26 = vunpack.c.l.s8.bf16 %v336_v24  ;;  %v450_v22 = vunpack.c.l.s8.bf16 %v442_v18 }
  0xae   :  { %387 = vmatprep.subr.bf16.mxu1 %v354_v23  ;;  %v459_v23 = vunpack.c.h.s8.bf16 %v446_v17 }
  0xaf   :  { %243 = vmatpush1.bf16.msra.mxu0 %v216_v25  ;;  %v353_v25 = vunpack.c.h.s8.bf16 %v333_v21  ;;  %v458_v21 = vunpack.c.l.s8.bf16 %v446_v17  ;;  %v1868_v17 = vmov 269488144  }
  0xb1   :  { %388 = vmatpush1.bf16.msra.mxu1 %v353_v25  ;;  %v2182_v25 = vunpack.c.l.bf16 %v165_v16  ;;  %1544 = vmatprep.subr.bf16.mxu0 %v458_v21  ;;  %v766_v16 = vld [vmem:[#allocation7] sm:$0xff] }
  0xb2   :  { %389 = vmatprep.subr.bf16.mxu1 %v356_v26  ;;  %v662_v26 = vunpack.c.0.s8 %v661_v20  ;;  %v782_v20 = vunpack.c.l.s8.bf16 %v766_v16 }
 0x110   :  { %v175_v30 = vpop.permute.xlu0 %174 }
 0x111   :  { %v177_v31 = vmul.f32 %v175_v30, %v169_v28  ;;  %v178_v32 = vmul.f32 %v175_v30, %v170_v29  ;;  %v355_v28 = vunpack.c.l.s8.bf16 %v335_v27  ;;  %v358_v29 = vunpack.c.h.s8.bf16 %v336_v24  ;;  %v338_v30 = vld [vmem:[%s2460_s5 + $0x38] sm:$0xff]  ;;  %v447_v24 = vld [vmem:[#allocation4 + $0x28] sm:$0xff] }
 0x113   :  { %v180_v33 = vsel %vm179_vm0, %v177_v31, 0.0  ;;  %v187_v34 = vsel %vm179_vm0, %v178_v32, 0.0  ;;  %390 = vmatpush1.bf16.msra.mxu1 %v355_v28  ;;  %v357_v31 = vunpack.c.h.s8.bf16 %v335_v27  ;;  %v360_v32 = vunpack.c.l.s8.bf16 %v338_v30 }
 0x114   :  { %v181_v35 = vrot.slane %v180_v33, 4  ;;  %v188_v36 = vrot.slane %v187_v34, 4  ;;  %391 = vmatprep.subr.bf16.mxu1 %v358_v29  ;;  %v451_v27 = vunpack.c.h.s8.bf16 %v442_v18  ;;  %v2185_v28 = vsub.s32 %v662_v26, %v2075_v54 }
 0x115   :  { %v460_v29 = vunpack.c.l.s8.bf16 %v447_v24  ;;  %v688_v18 = vunpack.c.l.s4 %v1868_v17  ;;  %v784_v26 = vunpack.c.h.s8.bf16 %v766_v16 }
 0x116   :  { %v182_v37 = vadd.f32 %v181_v35, %v180_v33  ;;  %v189_v38 = vadd.f32 %v188_v36, %v187_v34  ;;  %v337_v33 = vld [vmem:[%s2460_s5 + $0x30] sm:$0xff]  ;;  %v362_v35 = vunpack.c.h.s8.bf16 %v338_v30  ;;  %v340_v36 = vld [vmem:[%s2460_s5 + $0x48] sm:$0xff] }
 0x117   :  { %392 = vmatpush1.bf16.msra.mxu1 %v357_v31  ;;  %v359_v34 = vunpack.c.l.s8.bf16 %v337_v33  ;;  %v443_v30 = vld [vmem:[#allocation4 + $0x8] sm:$0xff]  ;;  %v676_v31 = vrot.slane %v2182_v25, %v2185_v28 }
 0x118   :  { %v183_v39 = vrot.slane %v182_v37, 2  ;;  %v190_v40 = vrot.slane %v189_v38, 2  ;;  %393 = vmatprep.subr.bf16.mxu1 %v360_v32  ;;  %v452_v32 = vunpack.c.l.s8.bf16 %v443_v30 }
 0x11a   :  { %v184_v41 = vadd.f32 %v183_v39, %v182_v37  ;;  %v191_v42 = vadd.f32 %v190_v40, %v189_v38  ;;  %v361_v37 = vunpack.c.h.s8.bf16 %v337_v33  ;;  %v364_v38 = vunpack.c.l.s8.bf16 %v340_v36  ;;  %v339_v39 = vld [vmem:[%s2460_s5 + $0x40] sm:$0xff] }
 0x11b   :  { %394 = vmatpush1.bf16.msra.mxu1 %v359_v34  ;;  %v363_v40 = vunpack.c.l.s8.bf16 %v339_v39  ;;  %v677_v33 = vcombine.high %v676_v31, %v676_v31  ;;  %v680_v34 = vsel %vm289_vm2, %v676_v31, 0.0 }
 0x11c   :  { %v185_v43 = vrot.slane %v184_v41, 1  ;;  %v192_v44 = vrot.slane %v191_v42, 1  ;;  %395 = vmatprep.subr.bf16.mxu1 %v362_v35  ;;  %v461_v35 = vunpack.c.h.s8.bf16 %v447_v24 }
 0x11e   :  { %v186_v45 = vadd.f32 %v185_v43, %v184_v41  ;;  %v193_v46 = vadd.f32 %v192_v44, %v191_v42  ;;  %v366_v41 = vunpack.c.h.s8.bf16 %v340_v36  ;;  %v365_v42 = vunpack.c.h.s8.bf16 %v339_v39  ;;  %v448_v36 = vld [vmem:[#allocation4 + $0x30] sm:$0xff] }
 0x11f   :  { %396 = vmatpush1.bf16.msra.mxu1 %v361_v37  ;;  %v681_v37 = vsel %vm289_vm2, %v677_v33, 0.0  ;;  %v453_v39 = vunpack.c.h.s8.bf16 %v443_v30  ;;  %v768_v30 = vld [vmem:[#allocation7 + $0x10] sm:$0xff] }
 0x120   :  { %v218_v47 = vpack.c.bf16 %v186_v45, %v186_v45  ;;  %v219_v48 = vpack.c.bf16 %v193_v46, %v193_v46  ;;  %397 = vmatprep.subr.bf16.mxu1 %v364_v38  ;;  %v682_v38 = vadd.f32 %v681_v37, %v680_v34  ;;  %v788_v37 = vunpack.c.h.s8.bf16 %v768_v30 }
 0x122   :  { %v222_v49 = vunpack.c.l.b16 %v218_v47  ;;  %v223_v50 = vunpack.c.l.b16 %v219_v48 }
 0x123   :  { %398 = vmatpush1.bf16.msra.mxu1 %v363_v40  ;;  %v462_v40 = vunpack.c.l.s8.bf16 %v448_v36 }
 0x124   :  { %v225_v51 = vsel %vm224_vm1, %v223_v50, %v222_v49  ;;  %399 = vmatprep.subr.bf16.mxu1 %v366_v41  ;;  %v444_v41 = vld [vmem:[#allocation4 + $0x10] sm:$0xff] }
 0x125   :  { %v226_v52 = vpack.c.b16 %v225_v51, %v225_v51 }
 0x127   :  { %261 = vmatmul.mubr.bf16.vlgmr.msra.gmra.mrb[0].mxu0 %v226_v52  ;;  %400 = vmatpush1.bf16.msra.mxu1 %v365_v42  ;;  %v342_v52 = vld [vmem:[%s2460_s5 + $0x58] sm:$0xff]  ;;  %v454_v42 = vunpack.c.l.s8.bf16 %v444_v41 }
 0x128   :  { %v368_v53 = vunpack.c.l.s8.bf16 %v342_v52  ;;  %1545 = vmatpush3.bf16.msra.mxu0 %v450_v22  ;;  %v769_v22 = vld [vmem:[#allocation7 + $0x18] sm:$0xff] }
 0x129   :  { %1546 = vmatprep.subr.bf16.mxu0 %v459_v23  ;;  %v689_v23 = vunpack.c.0.s8 %v688_v18  ;;  %v789_v34 = vunpack.c.h.s8.bf16 %v769_v22  ;;  %v781_v18 = vld [vmem:[#allocation7 + $0x78] sm:$0xff] }
 0x12a   :  { %401 = vmatprep.subr.bf16.mxu1 %v368_v53 }
 0x12c   :  { %1547 = vmatpush3.bf16.msra.mxu0 %v451_v27  ;;  %v2205_v27 = vsub.s32 %v689_v23, %v2075_v54  ;;  %v813_v23 = vunpack.c.h.s8.bf16 %v781_v18 }
 0x12d   :  { %1548 = vmatprep.subr.bf16.mxu0 %v460_v29  ;;  %v787_v29 = vunpack.c.l.s8.bf16 %v769_v22 }
 0x130   :  { %1549 = vmatpush3.bf16.msra.mxu0 %v452_v32  ;;  %v786_v32 = vunpack.c.l.s8.bf16 %v768_v30 }
 0x131   :  { %1550 = vmatprep.subr.bf16.mxu0 %v461_v35  ;;  %v771_v35 = vld [vmem:[#allocation7 + $0x28] sm:$0xff] }
 0x134   :  { %1551 = vmatpush3.bf16.msra.mxu0 %v453_v39  ;;  %v791_v39 = vunpack.c.l.s8.bf16 %v771_v35 }
 0x135   :  { %1552 = vmatprep.subr.bf16.mxu0 %v462_v40  ;;  %v770_v40 = vld [vmem:[#allocation7 + $0x20] sm:$0xff] }
 0x138   :  { %1553 = vmatpush3.bf16.msra.mxu0 %v454_v42 }
 0x1fa   :  { %v262_v1 = vpop.f32.mrb[0].mxu0 }
 0x1fb   :  { %v277_v3 = vmul.f32 %v272_v60, %v262_v1  ;;  %v264_v4 = vpop.f32.mrb[1].mxu0  ;;  %v341_v60 = vld [vmem:[%s2460_s5 + $0x50] sm:$0xff] }
 0x1fc   :  { %v278_v5 = vmul.f32 %v276_v62, %v264_v4  ;;  %v266_v6 = vpop.f32.mrb[2].mxu0  ;;  %v367_v62 = vunpack.c.l.s8.bf16 %v341_v60  ;;  %v369_v1 = vunpack.c.h.s8.bf16 %v341_v60 }
 0x1fd   :  { %v2111_v7 = vadd.f32 %v282_v63, %v277_v3  ;;  %v267_v8 = vpop.f32.mrb[3].mxu0  ;;  %v370_v63 = vunpack.c.h.s8.bf16 %v342_v52  ;;  %v343_v3 = vld [vmem:[%s2460_s5 + $0x60] sm:$0xff] }
 0x1fe   :  { %v2113_v9 = vadd.f32 %v286_v2, %v278_v5  ;;  %402 = vmatpush1.bf16.msra.mxu1 %v367_v62  ;;  %v344_v2 = vld [vmem:[%s2460_s5 + $0x68] sm:$0xff]  ;;  %v371_v5 = vunpack.c.l.s8.bf16 %v343_v3  ;;  %v346_v8 = vld [vmem:[%s2460_s5 + $0x78] sm:$0xff]  ;;  %v328_v62 = vrot.slane %v2103_v61, %v2078_v55 }
 0x1ff   :  { %v290_v10 = vsel %vm289_vm2, %v2111_v7, 0.0  ;;  %403 = vmatprep.subr.bf16.mxu1 %v370_v63  ;;  %v372_v4 = vunpack.c.l.s8.bf16 %v344_v2  ;;  %v374_v6 = vunpack.c.h.s8.bf16 %v344_v2  ;;  %v378_v14 = vunpack.c.h.s8.bf16 %v346_v8 }
 0x200   :  { %v291_v11 = vsel %vm289_vm2, %v2113_v9, 0.0 }
 0x201   :  { %v292_v12 = vadd.f32 %v291_v11, %v290_v10  ;;  %v373_v10 = vunpack.c.h.s8.bf16 %v343_v3  ;;  %v376_v11 = vunpack.c.l.s8.bf16 %v346_v8 }
 0x202   :  { %404 = vmatpush1.bf16.msra.mxu1 %v369_v1  ;;  %v324_v1 = vrot.slane %v2096_v59, %v2078_v55 }
 0x203   :  { %293 = vadd.xlane.f32.xlu0 %v292_v12  ;;  %405 = vmatprep.subr.bf16.mxu1 %v372_v4  ;;  %v345_v12 = vld [vmem:[%s2460_s5 + $0x70] sm:$0xff] }
 0x204   :  { %v375_v13 = vunpack.c.l.s8.bf16 %v345_v12  ;;  %v377_v15 = vunpack.c.h.s8.bf16 %v345_v12  ;;  %v445_v12 = vld [vmem:[#allocation4 + $0x18] sm:$0xff] }
 0x206   :  { %406 = vmatpush1.bf16.msra.mxu1 %v371_v5 }
 0x207   :  { %407 = vmatprep.subr.bf16.mxu1 %v374_v6 }
 0x20a   :  { %408 = vmatpush1.bf16.msra.mxu1 %v373_v10  ;;  %v449_v10 = vld [vmem:[#allocation4 + $0x38] sm:$0xff] }
 0x20b   :  { %409 = vmatprep.subr.bf16.mxu1 %v376_v11  ;;  %v464_v11 = vunpack.c.l.s8.bf16 %v449_v10 }
 0x20e   :  { %410 = vmatpush1.bf16.msra.mxu1 %v375_v13  ;;  %v465_v13 = vunpack.c.h.s8.bf16 %v449_v10  ;;  %v776_v10 = vld [vmem:[#allocation7 + $0x50] sm:$0xff] }
 0x20f   :  { %411 = vmatprep.subr.bf16.mxu1 %v378_v14  ;;  %v457_v14 = vunpack.c.h.s8.bf16 %v445_v12 }
 0x212   :  { %412 = vmatpush1.bf16.msra.mxu1 %v377_v15  ;;  %v767_v15 = vld [vmem:[#allocation7 + $0x8] sm:$0xff] }
 0x213   :  { %v783_v19 = vunpack.c.l.s8.bf16 %v767_v15  ;;  %v785_v21 = vunpack.c.h.s8.bf16 %v767_v15  ;;  %v778_v15 = vld [vmem:[#allocation7 + $0x60] sm:$0xff] }
 0x214   :  { %v806_v16 = vunpack.c.l.s8.bf16 %v778_v15 }
 0x215   :  { %827 = vmatprep.subr.bf16.mxu1 %v783_v19  ;;  %v808_v19 = vunpack.c.h.s8.bf16 %v778_v15 }
 0x290   :  { %v294_v43 = vpop.xlane.xlu0 %293 }
 0x291   :  { %v296_v44 = vmul.f32 0.00390625, %v294_v43  ;;  %v463_v43 = vunpack.c.h.s8.bf16 %v448_v36 }
 0x293   :  { %v2150_v45 = vsub.f32 %v2111_v7, %v296_v44  ;;  %v2153_v46 = vsub.f32 %v2113_v9, %v296_v44  ;;  %v455_v44 = vunpack.c.h.s8.bf16 %v444_v41  ;;  %1554 = vmatprep.subr.bf16.mxu0 %v463_v43  ;;  %v790_v43 = vunpack.c.l.s8.bf16 %v770_v40 }
 0x295   :  { %v299_v47 = vmul.f32 %v2150_v45, %v2150_v45  ;;  %v300_v48 = vmul.f32 %v2153_v46, %v2153_v46  ;;  %1555 = vmatpush3.bf16.msra.mxu0 %v455_v44 }
 0x296   :  { %1556 = vmatprep.subr.bf16.mxu0 %v464_v11 }
 0x297   :  { %v301_v49 = vsel %vm289_vm2, %v299_v47, 0.0  ;;  %v302_v50 = vsel %vm289_vm2, %v300_v48, 0.0 }
 0x298   :  { %v303_v51 = vadd.f32 %v302_v50, %v301_v49  ;;  %v2192_v50 = vsub.s32 1, %v2075_v54 }
 0x29a   :  { %304 = vadd.xlane.f32.xlu1 %v303_v51  ;;  %v318_v51 = vrot.slane %v2103_v61, %v2192_v50  ;;  %v314_v52 = vrot.slane %v2096_v59, %v2192_v50 }
 0x29e   :  { %683 = vadd.xlane.f32.xlu1 %v682_v38 }
 0x327   :  { %v305_v47 = vpop.xlane.xlu1 %304 }
 0x328   :  { %v306_v48 = vmul.f32 0.00390625, %v305_v47  ;;  %v793_v47 = vunpack.c.h.s8.bf16 %v771_v35 }
 0x32a   :  { %v307_v49 = vadd.f32 1e-05, %v306_v48 }
 0x32c   :  { %1642 = vrsqrt.f32 %v307_v49  ;;  %v773_v49 = vld [vmem:[#allocation7 + $0x38] sm:$0xff] }
 0x336   :  { %v1643_v53 = vpop.eup %1642 }
 0x337   :  { %v310_v60 = vmul.f32 %v1643_v53, %v2153_v46  ;;  %v309_v63 = vmul.f32 %v1643_v53, %v2150_v45  ;;  %v456_v46 = vunpack.c.l.s8.bf16 %v445_v12  ;;  %v684_v45 = vpop.xlane.xlu1 %683  ;;  %v772_v53 = vld [vmem:[#allocation7 + $0x30] sm:$0xff]  ;;  %v802_v12 = vunpack.c.l.s8.bf16 %v776_v10 }
 0x338   :  { %v685_v24 = vmul.f32 0.00390625, %v684_v45 }
 0x339   :  { %v320_v2 = vmul.f32 %v318_v51, %v310_v60  ;;  %v319_v3 = vmul.f32 %v314_v52, %v309_v63  ;;  %1557 = vmatpush3.bf16.msra.mxu0 %v456_v46  ;;  %v792_v51 = vunpack.c.h.s8.bf16 %v770_v40  ;;  %v795_v52 = vunpack.c.l.s8.bf16 %v773_v49  ;;  %v775_v63 = vld [vmem:[#allocation7 + $0x48] sm:$0xff] }
 0x33a   :  { %1558 = vmatprep.subr.bf16.mxu0 %v465_v13  ;;  %v693_v31 = vrot.slane %v685_v24, %v2205_v27  ;;  %v794_v60 = vunpack.c.l.s8.bf16 %v772_v53  ;;  %v779_v13 = vld [vmem:[#allocation7 + $0x68] sm:$0xff] }
 0x33b   :  { %v330_v4 = vadd.f32 %v328_v62, %v320_v2  ;;  %v329_v5 = vadd.f32 %v324_v1, %v319_v3  ;;  %v797_v62 = vunpack.c.h.s8.bf16 %v773_v49  ;;  %v796_v1 = vunpack.c.h.s8.bf16 %v772_v53  ;;  %v774_v3 = vld [vmem:[#allocation7 + $0x40] sm:$0xff]  ;;  %v2244_v49 = vld [vmem:[%s2458_s3 + $0x18] sm:$0xff] }
 0x33c   :  { %v2209_v33 = vsub.f32 %v2182_v25, %v693_v31  ;;  %v799_v2 = vunpack.c.l.s8.bf16 %v775_v63  ;;  %v807_v45 = vunpack.c.l.s8.bf16 %v779_v13  ;;  %v809_v17 = vunpack.c.h.s8.bf16 %v779_v13 }
 0x33d   :  { %v380_v6 = vpack.c.bf16 %v330_v4, %v330_v4  ;;  %v379_v8 = vpack.c.bf16 %v329_v5, %v329_v5  ;;  %1559 = vmatpush3.bf16.msra.mxu0 %v457_v14  ;;  %v798_v4 = vunpack.c.l.s8.bf16 %v774_v3  ;;  %v801_v5 = vunpack.c.h.s8.bf16 %v775_v63 }
 0x33e   :  { %v696_v36 = vmul.f32 %v2209_v33, %v2209_v33  ;;  %v804_v14 = vunpack.c.h.s8.bf16 %v776_v10  ;;  %v2260_v13 = vsub.s32 4, %v2075_v54 }
 0x33f   :  { %413 = vmatprep.mubr.bf16.mxu1 %v380_v6  ;;  %v800_v6 = vunpack.c.h.s8.bf16 %v774_v3 }
 0x340   :  { %414 = vmatmul.mubr.bf16.vlgmr.msra.gmra.mrb[0].mxu1 %v379_v8  ;;  %v704_v38 = vrot.slane %v696_v36, %v2185_v28  ;;  %v777_v8 = vld [vmem:[#allocation7 + $0x58] sm:$0xff]  ;;  %v516_v15 = vrot.slane %v2096_v59, %v2260_v13 }
 0x341   :  { %828 = vmatpush1.bf16.msra.mxu1 %v782_v20  ;;  %v803_v11 = vunpack.c.l.s8.bf16 %v777_v8  ;;  %v805_v46 = vunpack.c.h.s8.bf16 %v777_v8  ;;  %v811_v20 = vunpack.c.l.s8.bf16 %v781_v18 }
 0x342   :  { %829 = vmatprep.subr.bf16.mxu1 %v785_v21  ;;  %v705_v41 = vcombine.high %v704_v38, %v704_v38  ;;  %v708_v42 = vsel %vm289_vm2, %v704_v38, 0.0  ;;  %v780_v21 = vld [vmem:[#allocation7 + $0x70] sm:$0xff] }
 0x343   :  { %v810_v22 = vunpack.c.l.s8.bf16 %v780_v21  ;;  %v812_v24 = vunpack.c.h.s8.bf16 %v780_v21 }
 0x344   :  { %v709_v44 = vsel %vm289_vm2, %v705_v41, 0.0 }
 0x345   :  { %830 = vmatpush1.bf16.msra.mxu1 %v784_v26  ;;  %v710_v48 = vadd.f32 %v709_v44, %v708_v42  ;;  %v2217_v26 = vsub.s32 3, %v2075_v54 }
 0x346   :  { %831 = vmatprep.subr.bf16.mxu1 %v787_v29 }
 0x347   :  { %711 = vadd.xlane.f32.xlu1 %v710_v48  ;;  %v425_v29 = vrot.slane %v2083_v56, %v2217_v26  ;;  %v429_v30 = vrot.slane %v2091_v58, %v2217_v26  ;;  %v435_v31 = vrot.slane %v2096_v59, %v2217_v26  ;;  %v2239_v48 = vld [vmem:[%s2458_s3 + $0x10] sm:$0xff] }
 0x348   :  { %v749_v53 = vrot.slane %v2239_v48, %v2192_v50 }
 0x349   :  { %832 = vmatpush1.bf16.msra.mxu1 %v786_v32 }
 0x34a   :  { %833 = vmatprep.subr.bf16.mxu1 %v789_v34  ;;  %v439_v34 = vrot.slane %v2103_v61, %v2217_v26 }
 0x34d   :  { %834 = vmatpush1.bf16.msra.mxu1 %v788_v37 }
 0x34e   :  { %835 = vmatprep.subr.bf16.mxu1 %v791_v39 }
 0x351   :  { %836 = vmatpush1.bf16.msra.mxu1 %v790_v43 }
 0x352   :  { %837 = vmatprep.subr.bf16.mxu1 %v793_v47 }
 0x355   :  { %838 = vmatpush1.bf16.msra.mxu1 %v792_v51  ;;  %v729_v51 = vrot.slane %v2239_v48, %v2086_v57 }
 0x356   :  { %839 = vmatprep.subr.bf16.mxu1 %v795_v52  ;;  %v733_v52 = vrot.slane %v2244_v49, %v2086_v57 }
 0x359   :  { %840 = vmatpush1.bf16.msra.mxu1 %v794_v60  ;;  %v753_v60 = vrot.slane %v2244_v49, %v2192_v50 }
 0x35a   :  { %841 = vmatprep.subr.bf16.mxu1 %v797_v62  ;;  %v736_v62 = vcombine.low %v729_v51, %v733_v52 }
 0x35b   :  { %v756_v63 = vcombine.low %v749_v53, %v753_v60 }
 0x35c   :  { %v743_v3 = vrot.slane %v736_v62, %v2185_v28 }
 0x35d   :  { %842 = vmatpush1.bf16.msra.mxu1 %v796_v1 }
 0x35e   :  { %843 = vmatprep.subr.bf16.mxu1 %v799_v2 }
 0x361   :  { %844 = vmatpush1.bf16.msra.mxu1 %v798_v4 }
 0x362   :  { %845 = vmatprep.subr.bf16.mxu1 %v801_v5  ;;  %v763_v5 = vrot.slane %v756_v63, %v2185_v28 }
 0x365   :  { %846 = vmatpush1.bf16.msra.mxu1 %v800_v6 }
 0x366   :  { %847 = vmatprep.subr.bf16.mxu1 %v803_v11 }
 0x369   :  { %848 = vmatpush1.bf16.msra.mxu1 %v802_v12 }
 0x36a   :  { %849 = vmatprep.subr.bf16.mxu1 %v805_v46 }
 0x36d   :  { %850 = vmatpush1.bf16.msra.mxu1 %v804_v14 }
 0x36e   :  { %851 = vmatprep.subr.bf16.mxu1 %v807_v45 }
 0x371   :  { %852 = vmatpush1.bf16.msra.mxu1 %v806_v16 }
 0x372   :  { %853 = vmatprep.subr.bf16.mxu1 %v809_v17 }
 0x375   :  { %854 = vmatpush1.bf16.msra.mxu1 %v808_v19 }
 0x376   :  { %855 = vmatprep.subr.bf16.mxu1 %v811_v20 }
 0x379   :  { %856 = vmatpush1.bf16.msra.mxu1 %v810_v22 }
 0x37a   :  { %857 = vmatprep.subr.bf16.mxu1 %v813_v23 }
 0x37d   :  { %858 = vmatpush1.bf16.msra.mxu1 %v812_v24 }
 0x3d4   :  { %v712_v61 = vpop.xlane.xlu1 %711 }
 0x3d5   :  { %v713_v44 = vmul.f32 0.00390625, %v712_v61 }
 0x3d7   :  { %v714_v47 = vadd.f32 1e-05, %v713_v44  ;;  %v553_v44 = vld [vmem:[#allocation6 + $0x10] sm:$0xff] }
 0x3d9   :  { %1644 = vrsqrt.f32 %v714_v47  ;;  %v563_v47 = vunpack.c.l.s8.bf16 %v553_v44 }
 0x3e3   :  { %v1645_v1 = vpop.eup %1644 }
 0x3e4   :  { %v723_v2 = vrot.slane %v1645_v1, %v2205_v27  ;;  %v511_v27 = vrot.slane %v2083_v56, %v2260_v13 }
 0x3e6   :  { %v725_v4 = vmul.f32 %v723_v2, %v2209_v33 }
 0x3e8   :  { %v745_v6 = vmul.f32 %v743_v3, %v725_v4 }
 0x3ea   :  { %v765_v8 = vadd.f32 %v763_v5, %v745_v6  ;;  %v565_v5 = vunpack.c.h.s8.bf16 %v553_v44  ;;  %v556_v6 = vld [vmem:[#allocation6 + $0x28] sm:$0xff]  ;;  %v2283_v44 = vsub.s32 6, %v2075_v54 }
 0x3ec   :  { %v821_v10 = vrot.slane %v765_v8, %v2185_v28  ;;  %v568_v8 = vunpack.c.l.s8.bf16 %v556_v6 }
 0x3ee   :  { %v822_v11 = vcombine.high %v821_v10, %v821_v10  ;;  %v825_v12 = vpack.c.bf16 %v821_v10, %v821_v10  ;;  %v555_v10 = vld [vmem:[#allocation6 + $0x20] sm:$0xff] }
 0x3f0   :  { %v826_v46 = vpack.c.bf16 %v822_v11, %v822_v11  ;;  %v570_v11 = vunpack.c.h.s8.bf16 %v556_v6  ;;  %v888_v6 = vld [vmem:[#allocation9] sm:$0xff] }
 0x3f2   :  { %859 = vmatprep.mubr.bf16.mxu1 %v826_v46  ;;  %v558_v46 = vld [vmem:[#allocation6 + $0x38] sm:$0xff] }
 0x3f3   :  { %860 = vmatmul.mubr.bf16.vlgmr.msra.gmra.mrb[4].mxu1 %v825_v12  ;;  %v567_v12 = vunpack.c.l.s8.bf16 %v555_v10 }
 0x413   :  { %v415_v32 = vpop.f32.mrb[0].mxu1 }
 0x414   :  { %v430_v35 = vmul.f32 %v425_v29, %v415_v32  ;;  %v417_v36 = vpop.f32.mrb[1].mxu1 }
 0x415   :  { %v431_v37 = vmul.f32 %v429_v30, %v417_v36  ;;  %v419_v38 = vpop.f32.mrb[2].mxu1  ;;  %v551_v36 = vld [vmem:[#allocation6] sm:$0xff] }
 0x416   :  { %v2227_v39 = vadd.f32 %v435_v31, %v430_v35  ;;  %v420_v40 = vpop.f32.mrb[3].mxu1  ;;  %v552_v35 = vld [vmem:[#allocation6 + $0x8] sm:$0xff]  ;;  %v559_v38 = vunpack.c.l.s8.bf16 %v551_v36 }
 0x417   :  { %v2229_v41 = vadd.f32 %v439_v34, %v431_v37  ;;  %v560_v37 = vunpack.c.l.s8.bf16 %v552_v35  ;;  %v562_v40 = vunpack.c.h.s8.bf16 %v552_v35  ;;  %v2276_v35 = vld [vmem:[#allocation12 + $0x28] sm:$0xff] }
 0x418   :  { %v466_v43 = vpack.c.bf16 %v2227_v39, %v2227_v39 }
 0x419   :  { %v467_v42 = vpack.c.bf16 %v2229_v41, %v2229_v41  ;;  %576 = vmatprep.subr.bf16.mxu0 %v560_v37  ;;  %v1129_v37 = vunpack.c.l.s8.bf16 %v2276_v35 }
 0x41b   :  { %500 = vmatprep.mubr.bf16.mxu0 %v467_v42  ;;  %v554_v42 = vld [vmem:[#allocation6 + $0x18] sm:$0xff] }
 0x41c   :  { %501 = vmatmul.mubr.bf16.vlgmr.msra.gmra.mrb[4].mxu0 %v466_v43  ;;  %v561_v43 = vunpack.c.h.s8.bf16 %v551_v36  ;;  %v564_v61 = vunpack.c.l.s8.bf16 %v554_v42  ;;  %v566_v4 = vunpack.c.h.s8.bf16 %v554_v42 }
 0x41d   :  { %608 = vmatprep.mubr.bf16.mxu0 %v1866_v0  ;;  %577 = vmatpush1.bf16.msra.mxu0 %v559_v38  ;;  %v2279_v38 = vld [vmem:[#allocation12 + $0x20] sm:$0xff] }
 0x41e   :  { %578 = vmatprep.subr.bf16.mxu0 %v562_v40  ;;  %v1128_v40 = vunpack.c.l.s8.bf16 %v2279_v38 }
 0x421   :  { %579 = vmatpush1.bf16.msra.mxu0 %v561_v43 }
 0x422   :  { %580 = vmatprep.subr.bf16.mxu0 %v564_v61 }
 0x425   :  { %581 = vmatpush1.bf16.msra.mxu0 %v563_v47  ;;  %v2286_v47 = vsub.s32 5, %v2075_v54 }
 0x426   :  { %582 = vmatprep.subr.bf16.mxu0 %v566_v4  ;;  %v549_v4 = vrot.slane %v2096_v59, %v2283_v44 }
 0x429   :  { %583 = vmatpush1.bf16.msra.mxu0 %v565_v5 }
 0x42a   :  { %584 = vmatprep.subr.bf16.mxu0 %v568_v8 }
 0x42d   :  { %585 = vmatpush1.bf16.msra.mxu0 %v567_v12 }
 0x42e   :  { %586 = vmatprep.subr.bf16.mxu0 %v570_v11 }
 0x4c6   :  { %v2267_v51 = vpop.f32.mrb[4].mxu1 }
 0x4c7   :  { %v2269_v52 = vpop.f32.mrb[5].mxu1 }
 0x4c8   :  { %v865_v53 = vpop.f32.mrb[6].mxu1 }
 0x4c9   :  { %v866_v60 = vpop.f32.mrb[7].mxu1  ;;  %v875_v53 = vrot.slane %v2091_v58, %v2283_v44  ;;  %v896_v58 = vunpack.c.l.s8.bf16 %v888_v6 }
 0x4ca   :  { %v544_v60 = vrot.slane %v2096_v59, %v2286_v47 }
 0x4ef   :  { %v1560_v14 = vpop.f32.mrb[4].mxu0 }
 0x4f0   :  { %v1561_v45 = vpop.f32.mrb[5].mxu0 }
 0x4f1   :  { %v1562_v33 = vadd.f32 %v1561_v45, %v1560_v14  ;;  %v1563_v16 = vpop.f32.mrb[6].mxu0  ;;  %v569_v14 = vunpack.c.h.s8.bf16 %v555_v10  ;;  %v557_v45 = vld [vmem:[#allocation6 + $0x30] sm:$0xff] }
 0x4f2   :  { %v1564_v17 = vpop.f32.mrb[7].mxu0  ;;  %v892_v16 = vld [vmem:[#allocation9 + $0x20] sm:$0xff] }
 0x4f3   :  { %v512_v18 = vmul.f32 %v1562_v33, %v511_v27  ;;  %v572_v27 = vunpack.c.l.s8.bf16 %v558_v46  ;;  %587 = vmatpush1.bf16.msra.mxu0 %v569_v14  ;;  %v571_v33 = vunpack.c.l.s8.bf16 %v557_v45  ;;  %v573_v17 = vunpack.c.h.s8.bf16 %v557_v45 }
 0x4f4   :  { %v905_v12 = vunpack.c.h.s8.bf16 %v892_v16  ;;  %v897_v14 = vunpack.c.h.s8.bf16 %v888_v6 }
 0x4f5   :  { %v517_v19 = vadd.f32 %v516_v15, %v512_v18  ;;  %588 = vmatprep.subr.bf16.mxu0 %v572_v27  ;;  %v574_v15 = vunpack.c.h.s8.bf16 %v558_v46  ;;  %v904_v18 = vunpack.c.l.s8.bf16 %v892_v16  ;;  %v889_v27 = vld [vmem:[#allocation9 + $0x8] sm:$0xff] }
 0x4f6   :  { %v898_v59 = vunpack.c.l.s8.bf16 %v889_v27 }
 0x4f7   :  { %v519_v20 = vmul.f32 0.044715, %v517_v19  ;;  %v518_v30 = vmul.f32 0.5, %v517_v19  ;;  %589 = vmatpush1.bf16.msra.mxu0 %v571_v33  ;;  %v894_v33 = vld [vmem:[#allocation9 + $0x30] sm:$0xff] }
 0x4f8   :  { %590 = vmatprep.subr.bf16.mxu0 %v574_v15  ;;  %v899_v15 = vunpack.c.h.s8.bf16 %v889_v27  ;;  %v908_v16 = vunpack.c.l.s8.bf16 %v894_v33  ;;  %v1119_v27 = vld [vmem:[#allocation12 + $0x78] sm:$0xff] }
 0x4f9   :  { %v520_v21 = vmul.f32 %v519_v20, %v517_v19  ;;  %v1104_v20 = vld [vmem:[#allocation12] sm:$0xff] }
 0x4fb   :  { %v521_v22 = vmul.f32 %v520_v21, %v517_v19  ;;  %591 = vmatpush1.bf16.msra.mxu0 %v573_v17  ;;  %v890_v17 = vld [vmem:[#allocation9 + $0x10] sm:$0xff] }
 0x4fc   :  { %1566 = vmatprep.subr.bf16.mxu0 %v904_v18  ;;  %v900_v18 = vunpack.c.l.s8.bf16 %v890_v17 }
 0x4fd   :  { %v522_v23 = vadd.f32 %v521_v22, %v517_v19  ;;  %v1105_v19 = vld [vmem:[#allocation12 + $0x8] sm:$0xff]  ;;  %v1120_v22 = vunpack.c.l.s8.bf16 %v1104_v20 }
 0x4fe   :  { %v1121_v21 = vunpack.c.l.s8.bf16 %v1105_v19 }
 0x4ff   :  { %v523_v24 = vmul.f32 0.7978846, %v522_v23  ;;  %v1123_v23 = vunpack.c.h.s8.bf16 %v1105_v19  ;;  %v909_v19 = vunpack.c.h.s8.bf16 %v894_v33 }
 0x500   :  { %1165 = vmatprep.subr.bf16.mxu1 %v1121_v21  ;;  %v901_v21 = vunpack.c.h.s8.bf16 %v890_v17  ;;  %v2315_v17 = vsub.s32 7, %v2075_v54  ;;  %v1664_v54 = vld [vmem:[%s2458_s3] sm:$0xff] }
 0x501   :  { %1646 = vtanh.f32 %v523_v24  ;;  %v1107_v24 = vld [vmem:[#allocation12 + $0x18] sm:$0xff]  ;;  %1166 = vmatpush1.bf16.msra.mxu1 %v1120_v22  ;;  %v871_v22 = vrot.slane %v2083_v56, %v2283_v44 }
 0x502   :  { %1167 = vmatprep.subr.bf16.mxu1 %v1123_v23 }
 0x50b   :  { %v1647_v29 = vpop.eup %1646 }
 0x50c   :  { %v525_v31 = vadd.f32 1.0, %v1647_v29  ;;  %v1122_v29 = vunpack.c.h.s8.bf16 %v1104_v20  ;;  %v895_v20 = vld [vmem:[#allocation9 + $0x38] sm:$0xff] }
 0x50d   :  { %v910_v23 = vunpack.c.l.s8.bf16 %v895_v20 }
 0x50e   :  { %v526_v32 = vmul.f32 %v525_v31, %v518_v30  ;;  %v1125_v30 = vunpack.c.l.s8.bf16 %v1107_v24  ;;  %v1106_v31 = vld [vmem:[#allocation12 + $0x10] sm:$0xff]  ;;  %1168 = vmatpush1.bf16.msra.mxu1 %v1122_v29 }
 0x50f   :  { %v1126_v36 = vunpack.c.h.s8.bf16 %v1106_v31 }
 0x510   :  { %v527_v34 = vsel %vm289_vm2, %v526_v32, 0.0  ;;  %1169 = vmatprep.subr.bf16.mxu1 %v1125_v30  ;;  %v876_v30 = vmul.f32 %v871_v22, %v2267_v51  ;;  %v1130_v51 = vunpack.c.h.s8.bf16 %v2279_v38  ;;  %v630_v22 = vrot.slane %v1664_v54, %v2315_v17 }
 0x511   :  { %528 = vadd.xlane.f32.xlu1 %v527_v34  ;;  %v1127_v34 = vunpack.c.h.s8.bf16 %v1107_v24  ;;  %v891_v24 = vld [vmem:[#allocation9 + $0x18] sm:$0xff] }
 0x512   :  { %v902_v29 = vunpack.c.l.s8.bf16 %v891_v24 }
 0x59e   :  { %v529_v62 = vpop.xlane.xlu1 %528 }
 0x59f   :  { %v531_v63 = vmul.f32 0.0078125, %v529_v62 }
 0x5a1   :  { %v2271_v1 = vsub.f32 %v526_v32, %v531_v63  ;;  %v1124_v32 = vunpack.c.l.s8.bf16 %v1106_v31  ;;  %v877_v63 = vmul.f32 %v875_v53, %v2269_v52  ;;  %v893_v52 = vld [vmem:[#allocation9 + $0x28] sm:$0xff]  ;;  %v881_v31 = vrot.slane %v2239_v48, %v2078_v55 }
 0x5a2   :  { %v907_v45 = vunpack.c.h.s8.bf16 %v893_v52 }
 0x5a3   :  { %v533_v2 = vmul.f32 %v2271_v1, %v2271_v1  ;;  %1170 = vmatpush1.bf16.msra.mxu1 %v1124_v32  ;;  %v911_v32 = vunpack.c.h.s8.bf16 %v895_v20  ;;  %v2327_v20 = vld [vmem:[%s2458_s3 + $0x28] sm:$0xff] }
 0x5a4   :  { %1171 = vmatprep.subr.bf16.mxu1 %v1127_v34  ;;  %v903_v34 = vunpack.c.h.s8.bf16 %v891_v24  ;;  %v1665_v24 = vld [vmem:[%s2458_s3 + $0x8] sm:$0xff] }
 0x5a5   :  { %v534_v3 = vsel %vm289_vm2, %v533_v2, 0.0  ;;  %v885_v2 = vrot.slane %v2244_v49, %v2078_v55 }
 0x5a6   :  { %535 = vadd.xlane.f32.xlu1 %v534_v3 }
 0x5a7   :  { %1172 = vmatpush1.bf16.msra.mxu1 %v1126_v36  ;;  %v2298_v8 = vadd.f32 %v885_v2, %v877_v63  ;;  %v2307_v36 = vadd.f32 %v881_v31, %v876_v30  ;;  %v1112_v2 = vld [vmem:[#allocation12 + $0x40] sm:$0xff] }
 0x5a8   :  { %1173 = vmatprep.subr.bf16.mxu1 %v1129_v37  ;;  %v1131_v37 = vunpack.c.h.s8.bf16 %v2276_v35  ;;  %v1138_v38 = vunpack.c.h.s8.bf16 %v1112_v2 }
 0x5a9   :  { %v913_v46 = vpack.c.bf16 %v2298_v8, %v2298_v8  ;;  %v912_v56 = vpack.c.bf16 %v2307_v36, %v2307_v36 }
 0x5ab   :  { %1174 = vmatpush1.bf16.msra.mxu1 %v1128_v40  ;;  %v1111_v40 = vld [vmem:[#allocation12 + $0x38] sm:$0xff] }
 0x5ac   :  { %1175 = vmatprep.subr.bf16.mxu1 %v1131_v37  ;;  %v1135_v53 = vunpack.c.h.s8.bf16 %v1111_v40 }
 0x5af   :  { %1176 = vmatpush1.bf16.msra.mxu1 %v1130_v51 }
 0x633   :  { %v536_v42 = vpop.xlane.xlu1 %535 }
 0x634   :  { %v537_v43 = vmul.f32 0.0078125, %v536_v42  ;;  %v1133_v42 = vunpack.c.l.s8.bf16 %v1111_v40 }
 0x636   :  { %v538_v61 = vadd.f32 1e-05, %v537_v43  ;;  %v1110_v43 = vld [vmem:[#allocation12 + $0x30] sm:$0xff]  ;;  %1177 = vmatprep.subr.bf16.mxu1 %v1133_v42 }
 0x638   :  { %1648 = vrsqrt.f32 %v538_v61  ;;  %v1132_v61 = vunpack.c.l.s8.bf16 %v1110_v43 }
 0x63a   :  { %1178 = vmatpush1.bf16.msra.mxu1 %v1132_v61 }
 0x63b   :  { %1179 = vmatprep.subr.bf16.mxu1 %v1135_v53 }
 0x642   :  { %v1649_v62 = vpop.eup %1648 }
 0x643   :  { %v540_v3 = vmul.f32 %v1649_v62, %v2271_v1  ;;  %v906_v1 = vunpack.c.l.s8.bf16 %v893_v52  ;;  %v1113_v62 = vld [vmem:[#allocation12 + $0x48] sm:$0xff] }
 0x644   :  { %v1137_v63 = vunpack.c.l.s8.bf16 %v1113_v62  ;;  %v1139_v35 = vunpack.c.h.s8.bf16 %v1113_v62 }
 0x645   :  { %v545_v5 = vmul.f32 %v544_v60, %v540_v3  ;;  %v1134_v60 = vunpack.c.h.s8.bf16 %v1110_v43  ;;  %v1115_v3 = vld [vmem:[#allocation12 + $0x58] sm:$0xff] }
 0x647   :  { %v550_v10 = vadd.f32 %v549_v4, %v545_v5  ;;  %1180 = vmatpush1.bf16.msra.mxu1 %v1134_v60  ;;  %v1141_v4 = vunpack.c.l.s8.bf16 %v1115_v3  ;;  %v1114_v5 = vld [vmem:[#allocation12 + $0x50] sm:$0xff] }
 0x648   :  { %1181 = vmatprep.subr.bf16.mxu1 %v1137_v63  ;;  %v1140_v6 = vunpack.c.l.s8.bf16 %v1114_v5 }
 0x649   :  { %v575_v11 = vpack.c.bf16 %v550_v10, %v550_v10  ;;  %v1143_v10 = vunpack.c.h.s8.bf16 %v1115_v3 }
 0x64b   :  { %609 = vmatmul.mubr.bf16.vlgmr.msra.gmra.mrb[8].mxu0 %v575_v11  ;;  %v1142_v11 = vunpack.c.h.s8.bf16 %v1114_v5 }
 0x64c   :  { %1567 = vmatpush3.bf16.msra.mxu0 %v896_v58  ;;  %946 = vmatprep.mubr.bf16.mxu0 %v913_v46  ;;  %v1117_v58 = vld [vmem:[#allocation12 + $0x68] sm:$0xff]  ;;  %v1116_v46 = vld [vmem:[#allocation12 + $0x60] sm:$0xff] }
 0x64d   :  { %1568 = vmatprep.subr.bf16.mxu0 %v905_v12  ;;  %v1145_v12 = vunpack.c.l.s8.bf16 %v1117_v58  ;;  %v1144_v52 = vunpack.c.l.s8.bf16 %v1116_v46 }
 0x650   :  { %1569 = vmatpush3.bf16.msra.mxu0 %v897_v14  ;;  %v1147_v14 = vunpack.c.h.s8.bf16 %v1117_v58 }
 0x651   :  { %1570 = vmatprep.subr.bf16.mxu0 %v906_v1  ;;  %v1146_v1 = vunpack.c.h.s8.bf16 %v1116_v46 }
 0x654   :  { %1571 = vmatpush3.bf16.msra.mxu0 %v898_v59  ;;  %v1149_v59 = vunpack.c.l.s8.bf16 %v1119_v27 }
 0x655   :  { %1572 = vmatprep.subr.bf16.mxu0 %v907_v45  ;;  %v1118_v45 = vld [vmem:[#allocation12 + $0x70] sm:$0xff] }
 0x656   :  { %v1148_v33 = vunpack.c.l.s8.bf16 %v1118_v45 }
 0x658   :  { %1573 = vmatpush3.bf16.msra.mxu0 %v899_v15  ;;  %v1151_v15 = vunpack.c.h.s8.bf16 %v1119_v27 }
 0x659   :  { %1574 = vmatprep.subr.bf16.mxu0 %v908_v16  ;;  %v1150_v16 = vunpack.c.h.s8.bf16 %v1118_v45 }
 0x65c   :  { %1575 = vmatpush3.bf16.msra.mxu0 %v900_v18  ;;  %v2320_v18 = vld [vmem:[%s2458_s3 + $0x20] sm:$0xff] }
 0x65d   :  { %1576 = vmatprep.subr.bf16.mxu0 %v909_v19  ;;  %v620_v19 = vrot.slane %v2320_v18, %v2286_v47 }
 0x660   :  { %1577 = vmatpush3.bf16.msra.mxu0 %v901_v21  ;;  %v624_v21 = vrot.slane %v2327_v20, %v2286_v47 }
 0x661   :  { %1578 = vmatprep.subr.bf16.mxu0 %v910_v23 }
 0x664   :  { %1579 = vmatpush3.bf16.msra.mxu0 %v902_v29  ;;  %v634_v29 = vrot.slane %v1665_v24, %v2315_v17 }
 0x665   :  { %1580 = vmatprep.subr.bf16.mxu0 %v911_v32 }
 0x668   :  { %1581 = vmatpush3.bf16.msra.mxu0 %v903_v34 }
 0x66b   :  { %947 = vmatmul.mubr.bf16.vlgmr.msra.gmra.mrb[12].mxu0 %v912_v56 }
 0x66c   :  { %1053 = vmatprep.mubr.bf16.mxu0 %v1866_v0  ;;  %v1136_v0 = vunpack.c.l.s8.bf16 %v1112_v2 }
 0x66e   :  { %1182 = vmatpush1.bf16.msra.mxu1 %v1136_v0 }
 0x66f   :  { %1183 = vmatprep.subr.bf16.mxu1 %v1139_v35 }
 0x672   :  { %1184 = vmatpush1.bf16.msra.mxu1 %v1138_v38 }
 0x673   :  { %1185 = vmatprep.subr.bf16.mxu1 %v1141_v4 }
 0x676   :  { %1186 = vmatpush1.bf16.msra.mxu1 %v1140_v6 }
 0x677   :  { %1187 = vmatprep.subr.bf16.mxu1 %v1143_v10 }
 0x67a   :  { %1188 = vmatpush1.bf16.msra.mxu1 %v1142_v11 }
 0x67b   :  { %1189 = vmatprep.subr.bf16.mxu1 %v1145_v12 }
 0x67e   :  { %1190 = vmatpush1.bf16.msra.mxu1 %v1144_v52  ;;  %v957_v52 = vrot.slane %v2320_v18, %v2315_v17 }
 0x67f   :  { %1191 = vmatprep.subr.bf16.mxu1 %v1147_v14 }
 0x682   :  { %1192 = vmatpush1.bf16.msra.mxu1 %v1146_v1 }
 0x683   :  { %1193 = vmatprep.subr.bf16.mxu1 %v1149_v59  ;;  %v962_v59 = vrot.slane %v2239_v48, %v2217_v26 }
 0x686   :  { %1194 = vmatpush1.bf16.msra.mxu1 %v1148_v33 }
 0x687   :  { %1195 = vmatprep.subr.bf16.mxu1 %v1151_v15 }
 0x68a   :  { %1196 = vmatpush1.bf16.msra.mxu1 %v1150_v16 }
 0x71e   :  { %v610_v23 = vpop.f32.mrb[8].mxu0 }
 0x71f   :  { %v625_v30 = vmul.f32 %v620_v19, %v610_v23  ;;  %v612_v31 = vpop.f32.mrb[9].mxu0 }
 0x720   :  { %v626_v32 = vmul.f32 %v624_v21, %v612_v31  ;;  %v614_v34 = vpop.f32.mrb[10].mxu0 }
 0x721   :  { %v635_v56 = vadd.f32 %v630_v22, %v625_v30  ;;  %v615_v37 = vpop.f32.mrb[11].mxu0 }
 0x722   :  { %v636_v51 = vadd.f32 %v634_v29, %v626_v32  ;;  %v997_v37 = vld [vmem:[#allocation10 + $0x8] sm:$0xff] }
 0x723   :  { %v639_v40 = vmul.f32 0.044715, %v635_v56  ;;  %v637_v3 = vmul.f32 0.5, %v635_v56 }
 0x724   :  { %v640_v42 = vmul.f32 0.044715, %v636_v51  ;;  %v638_v5 = vmul.f32 0.5, %v636_v51 }
 0x725   :  { %v641_v43 = vmul.f32 %v639_v40, %v635_v56 }
 0x726   :  { %v642_v61 = vmul.f32 %v640_v42, %v636_v51  ;;  %v1007_v42 = vunpack.c.h.s8.bf16 %v997_v37 }
 0x727   :  { %v643_v53 = vmul.f32 %v641_v43, %v635_v56  ;;  %v999_v43 = vld [vmem:[#allocation10 + $0x18] sm:$0xff] }
 0x728   :  { %v644_v60 = vmul.f32 %v642_v61, %v636_v51 }
 0x729   :  { %v645_v62 = vadd.f32 %v643_v53, %v635_v56  ;;  %v1009_v53 = vunpack.c.l.s8.bf16 %v999_v43 }
 0x72a   :  { %v646_v63 = vadd.f32 %v644_v60, %v636_v51  ;;  %v1005_v51 = vunpack.c.l.s8.bf16 %v997_v37 }
 0x72b   :  { %v647_v2 = vmul.f32 0.7978846, %v645_v62 }
 0x72c   :  { %v648_v0 = vmul.f32 0.7978846, %v646_v63  ;;  %1021 = vmatprep.subr.bf16.mxu0 %v1005_v51  ;;  %v1230_v51 = vld [vmem:[#allocation13 + $0x10] sm:$0xff] }
 0x72d   :  { %1650 = vtanh.f32 %v647_v2 }
 0x72e   :  { %1652 = vtanh.f32 %v648_v0 }
 0x737   :  { %v1651_v35 = vpop.eup %1650 }
 0x738   :  { %v1653_v38 = vpop.eup %1652  ;;  %v651_v4 = vadd.f32 1.0, %v1651_v35  ;;  %v998_v35 = vld [vmem:[#allocation10 + $0x10] sm:$0xff] }
 0x739   :  { %v652_v6 = vadd.f32 1.0, %v1653_v38  ;;  %v1008_v38 = vunpack.c.l.s8.bf16 %v998_v35 }
 0x73a   :  { %v653_v10 = vmul.f32 %v651_v4, %v637_v3  ;;  %v1011_v3 = vunpack.c.h.s8.bf16 %v999_v43  ;;  %v1010_v4 = vunpack.c.h.s8.bf16 %v998_v35 }
 0x73b   :  { %v654_v58 = vmul.f32 %v652_v6, %v638_v5  ;;  %v1001_v5 = vld [vmem:[#allocation10 + $0x28] sm:$0xff] }
 0x73c   :  { %v655_v11 = vadd.f32 %v653_v10, %v2227_v39  ;;  %v1013_v6 = vunpack.c.l.s8.bf16 %v1001_v5  ;;  %v1000_v10 = vld [vmem:[#allocation10 + $0x20] sm:$0xff] }
 0x73d   :  { %v656_v12 = vadd.f32 %v654_v58, %v2229_v41  ;;  %v1012_v58 = vunpack.c.l.s8.bf16 %v1000_v10 }
 0x73e   :  { %v1582_v46 = vpop.f32.mrb[12].mxu0 }
 0x73f   :  { %v1583_v14 = vpop.f32.mrb[13].mxu0  ;;  %v659_v1 = vcombine.low %v655_v11, %v656_v12  ;;  %v1015_v11 = vunpack.c.h.s8.bf16 %v1001_v5  ;;  %v1014_v12 = vunpack.c.h.s8.bf16 %v1000_v10 }
 0x740   :  { %v1584_v27 = vadd.f32 %v1583_v14, %v1582_v46  ;;  %v1585_v45 = vpop.f32.mrb[14].mxu0  ;;  %v1003_v46 = vld [vmem:[#allocation10 + $0x38] sm:$0xff]  ;;  %v1002_v14 = vld [vmem:[#allocation10 + $0x30] sm:$0xff] }
 0x741   :  { %v1586_v33 = vpop.f32.mrb[15].mxu0  ;;  %v666_v15 = vrot.slane %v659_v1, %v2185_v28  ;;  %v1016_v1 = vunpack.c.l.s8.bf16 %v1002_v14  ;;  %v1229_v45 = vld [vmem:[#allocation13 + $0x8] sm:$0xff] }
 0x742   :  { %v958_v16 = vmul.f32 %v1584_v27, %v957_v52  ;;  %v1017_v52 = vunpack.c.l.s8.bf16 %v1003_v46  ;;  %v1019_v27 = vunpack.c.h.s8.bf16 %v1003_v46  ;;  %v1245_v33 = vunpack.c.l.s8.bf16 %v1229_v45 }
 0x743   :  { %v668_v19 = vadd.f32 %v666_v15, %v2182_v25 }
 0x744   :  { %v963_v39 = vadd.f32 %v962_v59, %v958_v16  ;;  %v1018_v59 = vunpack.c.h.s8.bf16 %v1002_v14 }
 0x745   :  { %v1159_v41 = vrot.slane %v668_v19, %v2185_v28  ;;  %v996_v28 = vld [vmem:[#allocation10] sm:$0xff] }
 0x746   :  { %v965_v21 = vmul.f32 0.044715, %v963_v39  ;;  %v964_v32 = vmul.f32 0.5, %v963_v39  ;;  %v1004_v40 = vunpack.c.l.s8.bf16 %v996_v28  ;;  %v1006_v61 = vunpack.c.h.s8.bf16 %v996_v28 }
 0x747   :  { %v1160_v54 = vcombine.high %v1159_v41, %v1159_v41  ;;  %v1163_v24 = vpack.c.bf16 %v1159_v41, %v1159_v41 }
 0x748   :  { %v966_v22 = vmul.f32 %v965_v21, %v963_v39  ;;  %1022 = vmatpush1.bf16.msra.mxu0 %v1004_v40 }
 0x749   :  { %v1164_v23 = vpack.c.bf16 %v1160_v54, %v1160_v54  ;;  %1023 = vmatprep.subr.bf16.mxu0 %v1007_v42  ;;  %v1233_v42 = vld [vmem:[#allocation13 + $0x28] sm:$0xff] }
 0x74a   :  { %v967_v29 = vmul.f32 %v966_v22, %v963_v39  ;;  %v989_v22 = vrot.slane %v2239_v48, %v2260_v13  ;;  %v1248_v13 = vunpack.c.l.s8.bf16 %v1230_v51  ;;  %v1253_v43 = vunpack.c.l.s8.bf16 %v1233_v42 }
 0x74b   :  { %1197 = vmatprep.mubr.bf16.mxu1 %v1164_v23 }
 0x74c   :  { %1198 = vmatmul.mubr.bf16.vlgmr.msra.gmra.mrb[8].mxu1 %v1163_v24  ;;  %v968_v30 = vadd.f32 %v967_v29, %v963_v39  ;;  %1024 = vmatpush1.bf16.msra.mxu0 %v1006_v61  ;;  %v994_v29 = vrot.slane %v2239_v48, %v2286_v47  ;;  %v1250_v47 = vunpack.c.h.s8.bf16 %v1230_v51  ;;  %v1232_v61 = vld [vmem:[#allocation13 + $0x20] sm:$0xff]  ;;  %v1635_v51 = vld [vmem:[%s2468_s13 + $0x20] sm:$0xff]  }
 0x74d   :  { %1025 = vmatprep.subr.bf16.mxu0 %v1009_v53  ;;  %v1252_v53 = vunpack.c.l.s8.bf16 %v1232_v61 }
 0x74e   :  { %v969_v26 = vmul.f32 0.7978846, %v968_v30 }
 0x750   :  { %1654 = vtanh.f32 %v969_v26  ;;  %1026 = vmatpush1.bf16.msra.mxu0 %v1008_v38  ;;  %v1228_v26 = vld [vmem:[#allocation13] sm:$0xff] }
 0x751   :  { %1027 = vmatprep.subr.bf16.mxu0 %v1011_v3  ;;  %v1246_v37 = vunpack.c.h.s8.bf16 %v1228_v26 }
 0x754   :  { %1028 = vmatpush1.bf16.msra.mxu0 %v1010_v4  ;;  %v1237_v4 = vld [vmem:[#allocation13 + $0x48] sm:$0xff] }
 0x755   :  { %1029 = vmatprep.subr.bf16.mxu0 %v1013_v6  ;;  %v1261_v5 = vunpack.c.l.s8.bf16 %v1237_v4  ;;  %v1236_v6 = vld [vmem:[#allocation13 + $0x40] sm:$0xff] }
 0x756   :  { %v1260_v10 = vunpack.c.l.s8.bf16 %v1236_v6 }
 0x758   :  { %1030 = vmatpush1.bf16.msra.mxu0 %v1012_v58  ;;  %v1263_v58 = vunpack.c.h.s8.bf16 %v1237_v4 }
 0x759   :  { %1031 = vmatprep.subr.bf16.mxu0 %v1015_v11  ;;  %v1262_v11 = vunpack.c.h.s8.bf16 %v1236_v6 }
 0x75a   :  { %v1655_v31 = vpop.eup %1654 }
 0x75b   :  { %v971_v34 = vadd.f32 1.0, %v1655_v31 }
 0x75c   :  { %1032 = vmatpush1.bf16.msra.mxu0 %v1014_v12  ;;  %v1239_v12 = vld [vmem:[#allocation13 + $0x58] sm:$0xff] }
 0x75d   :  { %v972_v56 = vmul.f32 %v971_v34, %v964_v32  ;;  %1033 = vmatprep.subr.bf16.mxu0 %v1017_v52  ;;  %v1244_v32 = vunpack.c.l.s8.bf16 %v1228_v26  ;;  %v1265_v46 = vunpack.c.l.s8.bf16 %v1239_v12  ;;  %v1238_v52 = vld [vmem:[#allocation13 + $0x50] sm:$0xff]  ;;  %v1627_v26 = vld [vmem:[%s2468_s13] sm:$0xff]  }
 0x75e   :  { %v1264_v14 = vunpack.c.l.s8.bf16 %v1238_v52 }
 0x75f   :  { %v973_v25 = vsel %vm289_vm2, %v972_v56, 0.0 }
 0x760   :  { %974 = vadd.xlane.f32.xlu1 %v973_v25  ;;  %1034 = vmatpush1.bf16.msra.mxu0 %v1016_v1  ;;  %v1231_v25 = vld [vmem:[#allocation13 + $0x18] sm:$0xff]  ;;  %v1267_v1 = vunpack.c.h.s8.bf16 %v1239_v12 }
 0x761   :  { %1035 = vmatprep.subr.bf16.mxu0 %v1019_v27  ;;  %v1249_v28 = vunpack.c.l.s8.bf16 %v1231_v25  ;;  %v1251_v40 = vunpack.c.h.s8.bf16 %v1231_v25  ;;  %v1266_v27 = vunpack.c.h.s8.bf16 %v1238_v52  ;;  %v1632_v25 = vld [vmem:[%s2468_s13 + $0x58] sm:$0xff]  }
 0x764   :  { %1036 = vmatpush1.bf16.msra.mxu0 %v1018_v59  ;;  %v1241_v59 = vld [vmem:[#allocation13 + $0x68] sm:$0xff] }
 0x765   :  { %1278 = vmatprep.subr.bf16.mxu0 %v1245_v33  ;;  %v1240_v33 = vld [vmem:[#allocation13 + $0x60] sm:$0xff] }
 0x7ed   :  { %v975_v60 = vpop.xlane.xlu1 %974 }
 0x7ee   :  { %v976_v62 = vmul.f32 0.0078125, %v975_v60  ;;  %v1255_v60 = vunpack.c.h.s8.bf16 %v1233_v42 }
 0x7f0   :  { %v977_v63 = vsub.f32 %v972_v56, %v976_v62  ;;  %v1247_v56 = vunpack.c.h.s8.bf16 %v1229_v45  ;;  %v1235_v62 = vld [vmem:[#allocation13 + $0x38] sm:$0xff]  ;;  %v1269_v45 = vunpack.c.l.s8.bf16 %v1241_v59 }
 0x7f1   :  { %v1259_v38 = vunpack.c.h.s8.bf16 %v1235_v62 }
 0x7f2   :  { %v978_v2 = vmul.f32 %v977_v63, %v977_v63 }
 0x7f4   :  { %v979_v0 = vsel %vm289_vm2, %v978_v2, 0.0  ;;  %v1257_v2 = vunpack.c.l.s8.bf16 %v1235_v62 }
 0x7f5   :  { %980 = vadd.xlane.f32.xlu1 %v979_v0  ;;  %v1234_v0 = vld [vmem:[#allocation13 + $0x30] sm:$0xff] }
 0x7f6   :  { %v1256_v35 = vunpack.c.l.s8.bf16 %v1234_v0  ;;  %v1258_v3 = vunpack.c.h.s8.bf16 %v1234_v0 }
 0x81f   :  { %v2350_v15 = vpop.f32.mrb[8].mxu1 }
 0x820   :  { %v2352_v16 = vpop.f32.mrb[9].mxu1 }
 0x821   :  { %v1203_v19 = vpop.f32.mrb[10].mxu1 }
 0x822   :  { %v1204_v39 = vpop.f32.mrb[11].mxu1  ;;  %v1268_v19 = vunpack.c.l.s8.bf16 %v1240_v33 }
 0x823   :  { %v1271_v39 = vunpack.c.h.s8.bf16 %v1241_v59 }
 0x882   :  { %v981_v41 = vpop.xlane.xlu1 %980 }
 0x883   :  { %v982_v21 = vmul.f32 0.0078125, %v981_v41  ;;  %v1243_v41 = vld [vmem:[#allocation13 + $0x78] sm:$0xff] }
 0x885   :  { %v983_v54 = vadd.f32 1e-05, %v982_v21  ;;  %v1270_v21 = vunpack.c.h.s8.bf16 %v1240_v33 }
 0x887   :  { %1656 = vrsqrt.f32 %v983_v54  ;;  %v1273_v54 = vunpack.c.l.s8.bf16 %v1243_v41 }
 0x891   :  { %v1657_v23 = vpop.eup %1656 }
 0x892   :  { %v985_v24 = vmul.f32 %v1657_v23, %v977_v63  ;;  %v1254_v63 = vunpack.c.h.s8.bf16 %v1232_v61 }
 0x894   :  { %v990_v30 = vmul.f32 %v989_v22, %v985_v24  ;;  %v1242_v22 = vld [vmem:[#allocation13 + $0x70] sm:$0xff]  ;;  %v1275_v24 = vunpack.c.h.s8.bf16 %v1243_v41 }
 0x895   :  { %v1272_v23 = vunpack.c.l.s8.bf16 %v1242_v22 }
 0x896   :  { %v995_v31 = vadd.f32 %v994_v29, %v990_v30  ;;  %v1274_v29 = vunpack.c.h.s8.bf16 %v1242_v22  ;;  %v1626_v30 = vld [vmem:[%s2468_s13 + $0x40] sm:$0xff]   ;;  %v1636_v22 = vld [vmem:[%s2468_s13 + $0x68] sm:$0xff]  }
 0x897   :  { %1588 = vmatprep.subr.bf16.mxu1 %v1626_v30 }
 0x898   :  { %v1020_v34 = vpack.c.bf16 %v995_v31, %v995_v31  ;;  %v1628_v31 = vld [vmem:[%s2468_s13 + $0x48] sm:$0xff]   ;;  %1589 = vmatpush3.bf16.msra.mxu1 %v1627_v26  ;;  %v1666_v26 = vld [vmem:[%s2458_s3 + $0x10] sm:$0xff] }
 0x899   :  { %1590 = vmatprep.subr.bf16.mxu1 %v1628_v31  ;;  %v1219_v31 = vrot.slane %v1666_v26, %v2315_v17 }
 0x89a   :  { %1054 = vmatmul.mubr.bf16.vlgmr.msra.gmra.mrb[16].mxu0 %v1020_v34  ;;  %v1630_v34 = vld [vmem:[%s2468_s13 + $0x50] sm:$0xff]  }
 0x89b   :  { %1279 = vmatpush1.bf16.msra.mxu0 %v1244_v32  ;;  %v1629_v32 = vld [vmem:[%s2468_s13 + $0x8] sm:$0xff]  }
 0x89c   :  { %1280 = vmatprep.subr.bf16.mxu0 %v1247_v56  ;;  %1591 = vmatpush3.bf16.msra.mxu1 %v1629_v32  ;;  %v1631_v56 = vld [vmem:[%s2468_s13 + $0x10] sm:$0xff]  }
 0x89d   :  { %1592 = vmatprep.subr.bf16.mxu1 %v1630_v34 }
 0x89f   :  { %1281 = vmatpush1.bf16.msra.mxu0 %v1246_v37  ;;  %v1633_v37 = vld [vmem:[%s2468_s13 + $0x18] sm:$0xff]  }
 0x8a0   :  { %1282 = vmatprep.subr.bf16.mxu0 %v1249_v28  ;;  %1593 = vmatpush3.bf16.msra.mxu1 %v1631_v56  ;;  %v1634_v28 = vld [vmem:[%s2468_s13 + $0x60] sm:$0xff]   ;;  %v1667_v56 = vld [vmem:[%s2458_s3 + $0x18] sm:$0xff] }
 0x8a1   :  { %1594 = vmatprep.subr.bf16.mxu1 %v1632_v25  ;;  %v1223_v25 = vrot.slane %v1667_v56, %v2315_v17 }
 0x8a3   :  { %1283 = vmatpush1.bf16.msra.mxu0 %v1248_v13  ;;  %v2391_v13 = vld [vmem:[%s2458_s3 + $0x30] sm:$0x7] }
 0x8a4   :  { %1284 = vmatprep.subr.bf16.mxu0 %v1251_v40  ;;  %1595 = vmatpush3.bf16.msra.mxu1 %v1633_v37  ;;  %v2396_v40 = vld [vmem:[%s2458_s3 + $0x38] sm:$0x7]  ;;  %v1065_v42 = vrot.slane %v2391_v13, %v2086_v57  ;;  %v1322_v32 = vrot.slane %v2391_v13, %v2078_v55  ;;  %v1332_v37 = vrot.slane %v2320_v18, %v2086_v57 }
 0x8a5   :  { %1596 = vmatprep.subr.bf16.mxu1 %v1634_v28 }
 0x8a7   :  { %1285 = vmatpush1.bf16.msra.mxu0 %v1250_v47  ;;  %v1069_v47 = vrot.slane %v2396_v40, %v2086_v57 }
 0x8a8   :  { %1286 = vmatprep.subr.bf16.mxu0 %v1253_v43  ;;  %1597 = vmatpush3.bf16.msra.mxu1 %v1635_v51  ;;  %v1075_v43 = vrot.slane %v2239_v48, %v2283_v44  ;;  %v1336_v51 = vrot.slane %v2327_v20, %v2086_v57  ;;  %v1380_v20 = vrot.slane %v2320_v18, %v2192_v50 }
 0x8a9   :  { %1598 = vmatprep.subr.bf16.mxu1 %v1636_v22 }
 0x8ab   :  { %1287 = vmatpush1.bf16.msra.mxu0 %v1252_v53  ;;  %v1079_v53 = vrot.slane %v2244_v49, %v2283_v44 }
 0x8ac   :  { %1288 = vmatprep.subr.bf16.mxu0 %v1255_v60 }
 0x8af   :  { %1289 = vmatpush1.bf16.msra.mxu0 %v1254_v63 }
 0x8b0   :  { %1290 = vmatprep.subr.bf16.mxu0 %v1257_v2 }
 0x8b3   :  { %1291 = vmatpush1.bf16.msra.mxu0 %v1256_v35 }
 0x8b4   :  { %1292 = vmatprep.subr.bf16.mxu0 %v1259_v38 }
 0x8b7   :  { %1293 = vmatpush1.bf16.msra.mxu0 %v1258_v3 }
 0x8b8   :  { %1294 = vmatprep.subr.bf16.mxu0 %v1261_v5 }
 0x8bb   :  { %1295 = vmatpush1.bf16.msra.mxu0 %v1260_v10 }
 0x8bc   :  { %1296 = vmatprep.subr.bf16.mxu0 %v1263_v58 }
 0x8bf   :  { %1297 = vmatpush1.bf16.msra.mxu0 %v1262_v11 }
 0x8c0   :  { %1298 = vmatprep.subr.bf16.mxu0 %v1265_v46 }
 0x8c3   :  { %1299 = vmatpush1.bf16.msra.mxu0 %v1264_v14 }
 0x8c4   :  { %1300 = vmatprep.subr.bf16.mxu0 %v1267_v1 }
 0x8c7   :  { %1301 = vmatpush1.bf16.msra.mxu0 %v1266_v27 }
 0x8c8   :  { %1302 = vmatprep.subr.bf16.mxu0 %v1269_v45 }
 0x8cb   :  { %1303 = vmatpush1.bf16.msra.mxu0 %v1268_v19 }
 0x8cc   :  { %1304 = vmatprep.subr.bf16.mxu0 %v1271_v39 }
 0x8cf   :  { %1305 = vmatpush1.bf16.msra.mxu0 %v1270_v21 }
 0x8d0   :  { %1306 = vmatprep.subr.bf16.mxu0 %v1273_v54 }
 0x8d3   :  { %1307 = vmatpush1.bf16.msra.mxu0 %v1272_v23  ;;  %v1637_v23 = vld [vmem:[%s2468_s13 + $0x28] sm:$0xff]  }
 0x8d4   :  { %1308 = vmatprep.subr.bf16.mxu0 %v1275_v24  ;;  %1599 = vmatpush3.bf16.msra.mxu1 %v1637_v23  ;;  %v1209_v24 = vrot.slane %v2391_v13, %v2192_v50 }
 0x8d6   :  { %v1214_v30 = vmul.f32 %v1209_v24, %v2350_v15  ;;  %v1326_v15 = vrot.slane %v2396_v40, %v2078_v55 }
 0x8d7   :  { %1309 = vmatpush1.bf16.msra.mxu0 %v1274_v29  ;;  %v1213_v29 = vrot.slane %v2396_v40, %v2192_v50 }
 0x8d9   :  { %v1215_v34 = vmul.f32 %v1213_v29, %v2352_v16 }
 0x8db   :  { %v1225_v16 = vadd.f32 %v1223_v25, %v1215_v34 }
 0x96d   :  { %v1055_v61 = vpop.f32.mrb[16].mxu0 }
 0x96e   :  { %v1070_v60 = vmul.f32 %v1065_v42, %v1055_v61  ;;  %v1057_v62 = vpop.f32.mrb[17].mxu0  ;;  %v1224_v42 = vadd.f32 %v1219_v31, %v1214_v30 }
 0x96f   :  { %v1071_v63 = vmul.f32 %v1069_v47, %v1057_v62  ;;  %v1059_v2 = vpop.f32.mrb[18].mxu0 }
 0x970   :  { %v1080_v0 = vadd.f32 %v1075_v43, %v1070_v60  ;;  %v1060_v35 = vpop.f32.mrb[19].mxu0  ;;  %v1226_v17 = vmax.f32 %v1224_v42, 0.0  ;;  %v1227_v2 = vmax.f32 %v1225_v16, 0.0 }
 0x971   :  { %v1081_v38 = vadd.f32 %v1079_v53, %v1071_v63 }
 0x972   :  { %v1084_v3 = vmul.f32 0.044715, %v1080_v0  ;;  %v1082_v52 = vmul.f32 0.5, %v1080_v0 }
 0x973   :  { %v1085_v4 = vmul.f32 0.044715, %v1081_v38  ;;  %v1083_v1 = vmul.f32 0.5, %v1081_v38 }
 0x974   :  { %v1086_v5 = vmul.f32 %v1084_v3, %v1080_v0 }
 0x975   :  { %v1087_v6 = vmul.f32 %v1085_v4, %v1081_v38 }
 0x976   :  { %v1088_v10 = vmul.f32 %v1086_v5, %v1080_v0 }
 0x977   :  { %v1089_v58 = vmul.f32 %v1087_v6, %v1081_v38 }
 0x978   :  { %v1090_v11 = vadd.f32 %v1088_v10, %v1080_v0 }
 0x979   :  { %v1091_v12 = vadd.f32 %v1089_v58, %v1081_v38 }
 0x97a   :  { %v1092_v48 = vmul.f32 0.7978846, %v1090_v11 }
 0x97b   :  { %v1093_v46 = vmul.f32 0.7978846, %v1091_v12 }
 0x97c   :  { %1658 = vtanh.f32 %v1092_v48 }
 0x97d   :  { %1660 = vtanh.f32 %v1093_v46 }
 0x986   :  { %v1659_v49 = vpop.eup %1658 }
 0x987   :  { %v1661_v44 = vpop.eup %1660  ;;  %v1096_v14 = vadd.f32 1.0, %v1659_v49 }
 0x988   :  { %v1097_v27 = vadd.f32 1.0, %v1661_v44 }
 0x989   :  { %v1098_v59 = vmul.f32 %v1096_v14, %v1082_v52 }
 0x98a   :  { %v1099_v45 = vmul.f32 %v1097_v27, %v1083_v1 }
 0x98b   :  { %v1100_v33 = vadd.f32 %v1098_v59, %v2307_v36  ;;  %v1641_v36 = vld [vmem:[%s2468_s13 + $0x38] sm:$0xff]  }
 0x98c   :  { %v1101_v19 = vadd.f32 %v1099_v45, %v2298_v8  ;;  %v1640_v8 = vld [vmem:[%s2468_s13 + $0x78] sm:$0xff]  }
 0x98d   :  { %v1102_v39 = vadd.f32 %v1100_v33, %v2111_v7  ;;  %v1638_v7 = vld [vmem:[%s2468_s13 + $0x70] sm:$0xff]  }
 0x98e   :  { %v1103_v41 = vadd.f32 %v1101_v19, %v2113_v9  ;;  %v1639_v9 = vld [vmem:[%s2468_s13 + $0x30] sm:$0xff]   ;;  %1600 = vmatprep.subr.bf16.mxu1 %v1638_v7 }
 0x98f   :  { %v1276_v54 = vpack.c.bf16 %v1102_v39, %v1102_v39  ;;  %1601 = vmatpush3.bf16.msra.mxu1 %v1639_v9 }
 0x990   :  { %v1277_v21 = vpack.c.bf16 %v1103_v41, %v1103_v41  ;;  %1602 = vmatprep.subr.bf16.mxu1 %v1640_v8 }
 0x992   :  { %1310 = vmatprep.mubr.bf16.mxu0 %v1277_v21 }
 0x993   :  { %1311 = vmatmul.mubr.bf16.vlgmr.msra.gmra.mrb[20].mxu0 %v1276_v54  ;;  %1603 = vmatpush3.bf16.msra.mxu1 %v1641_v36 }
 0xa66   :  { %v1312_v28 = vpop.f32.mrb[20].mxu0 }
 0xa67   :  { %v1327_v13 = vmul.f32 %v1322_v32, %v1312_v28  ;;  %v1314_v47 = vpop.f32.mrb[21].mxu0 }
 0xa68   :  { %v1328_v43 = vmul.f32 %v1326_v15, %v1314_v47  ;;  %v1316_v61 = vpop.f32.mrb[22].mxu0 }
 0xa69   :  { %v1337_v53 = vadd.f32 %v1332_v37, %v1327_v13  ;;  %v1317_v60 = vpop.f32.mrb[23].mxu0 }
 0xa6a   :  { %v1338_v62 = vadd.f32 %v1336_v51, %v1328_v43 }
 0xa6b   :  { %v1339_v63 = vmax.f32 %v1337_v53, 0.0 }
 0xa6c   :  { %v1340_v55 = vmax.f32 %v1338_v62, 0.0 }
 0xa6d   :  { %v1341_v40 = vadd.f32 %v1339_v63, %v1226_v17 }
 0xa6e   :  { %v1342_v0 = vadd.f32 %v1340_v55, %v1227_v2 }
 0xa6f   :  { %v1343_v38 = vpack.c.bf16 %v1341_v40, %v1341_v40 }
 0xa70   :  { %v1344_v35 = vpack.c.bf16 %v1342_v0, %v1342_v0 }
 0xa72   :  { %1509 = vmatprep.mubr.bf16.mxu1 %v1344_v35 }
 0xa73   :  { %1510 = vmatmul.mubr.bf16.vlgmr.msra.gmra.mrb[12].mxu1 %v1343_v38 }
 0xb46   :  { %v1604_v57 = vpop.f32.mrb[12].mxu1 }
 0xb47   :  { %v1605_v3 = vpop.f32.mrb[13].mxu1 }
 0xb48   :  { %v1606_v4 = vadd.f32 %v1605_v3, %v1604_v57  ;;  %v1607_v5 = vpop.f32.mrb[14].mxu1 }
 0xb49   :  { %v1608_v6 = vpop.f32.mrb[15].mxu1 }
 0xb4a   :  { %v1512_v10 = vadd.f32 %v1606_v4, %v1380_v20 }
 0xb4c   :  { %1518 = vst.msk [vmem:[%s2469_s14] sm:$0x3] %vm1517_vm3, %v1512_v10 }
 0xb4d   :  { %1523 = vsyncpa [#allocation3], 1 }
 0xb4e   :  { %1524 = vsyncpa [#allocation5], 1 }
 0xb4f   :  { %1525 = vsyncpa [#allocation8], 1 }
 0xb50   :  { %1526 = vsyncpa [#allocation11], 1 }
 0xb51   :  { %1527 = vsyncpa [#allocation14], 1 }

</bundles_post_ra>
